<compile_context>
chip_gen: v7x
topology: tpu7x:2x2x1
jax: 0.10.0
libtpu: 0.0.40
codegen_flags: <defaults>
</compile_context>

<pallas_src>
import jax
import jax.numpy as jnp
from jax.experimental import pallas as pl
from jax.experimental.pallas import tpu as pltpu


# --------------------------- tiling configuration ---------------------------

_CONV_TILE_IMAGES = 64   # images per conv grid step (multiple of 16). ~15 MB of
                         # double-buffered conv1 patches -> fits v7x VMEM; on
                         # v5e/v6e (128 MiB VMEM) this can be raised to 128-256.
_FC_TILE_ROWS = 1024     # rows per fc grid step (VMEM per step stays < 2 MB).


def _round_up(x, m):
    return ((x + m - 1) // m) * m


def _batch_tile(B, cap):
    """Images/rows per grid step.

    * B < 32: a single full-array block (block == full dims, so the (8,128)
      alignment rule is satisfied regardless of B).
    * otherwise: a multiple of 16 (sublane-aligned bf16 row counts for both conv
      layers' pooled-pixel counts 196 / 25), capped for VMEM, and sized so the
      grid has >= 2 steps (keeps both v7x TensorCores busy; no-op on v5e/v6e).
    """
    if B < 32:
        return B
    half = _round_up(pl.cdiv(B, 2), 16)
    return min(cap, half)


# ----------------------------- Pallas kernels -------------------------------

def _conv_pool_kernel(p_ref, w_ref, b_ref, o_ref):
    """Fused conv-as-matmul + bias + ReLU + 2x2/2 max-pool for TB images.

    p_ref: [4, TB*M, K] bf16  im2col patches of the 4 pooling phases
                              (phase = 2*(oh%2) + (ow%2); M = pooled OH*OW)
    w_ref: [K, N]       bf16  HWIO-flattened conv weight (resident across dots)
    b_ref: [1, N]       f32
    o_ref: [TB*M, N]    bf16  pooled activation, rows in (img, i*PW + j) order (NHWC)
    """
    w = w_ref[...]
    # maxpool(relu(conv + b)) == relu(max over the 4 phase-offset convs + b):
    # bias is a per-channel constant and relu is monotone.
    y = jnp.dot(p_ref[0], w, preferred_element_type=jnp.float32)
    for p in range(1, 4):
        y = jnp.maximum(y, jnp.dot(p_ref[p], w, preferred_element_type=jnp.float32))
    o_ref[...] = jnp.maximum(y + b_ref[...], 0.0).astype(o_ref.dtype)


def conv_relu_pool(patches, w, b, *, m_per_image):
    """patches: [4, B*M, K] bf16; w: [K, N] bf16; b: [N] f32 -> [B*M, N] bf16."""
    _, BM, K = patches.shape
    N = w.shape[1]
    B = BM // m_per_image
    tb = _batch_tile(B, _CONV_TILE_IMAGES)
    tm = tb * m_per_image
    grid = (pl.cdiv(BM, tm),)

    patch_block_bytes = 4 * tm * K * 2
    out_block_bytes = tm * N * 2
    vmem_limit = int(min(64 << 20,
                         max(32 << 20,
                             2 * (patch_block_bytes + out_block_bytes) + (2 << 20))))
    cost = pl.CostEstimate(
        flops=2 * 4 * BM * K * N,
        transcendentals=0,
        bytes_accessed=4 * BM * K * 2 + K * N * 2 + N * 4 + BM * N * 2)

    return pl.pallas_call(
        _conv_pool_kernel,
        out_shape=jax.ShapeDtypeStruct((BM, N), jnp.bfloat16),
        grid=grid,
        in_specs=[
            pl.BlockSpec((4, tm, K), lambda i: (0, i, 0)),
            pl.BlockSpec((K, N), lambda i: (0, 0)),
            pl.BlockSpec((1, N), lambda i: (0, 0)),
        ],
        out_specs=pl.BlockSpec((tm, N), lambda i: (i, 0)),
        compiler_params=pltpu.CompilerParams(
            dimension_semantics=("parallel",),
            vmem_limit_bytes=vmem_limit),
        cost_estimate=cost,
    )(patches, w, b.reshape(1, N))


def _fc_stack_kernel(x_ref, w1_ref, b1_ref, w2_ref, b2_ref, w3_ref, b3_ref, o_ref):
    """o = relu(relu(x@w1+b1)@w2+b2)@w3 + b3; all FC weights resident in VMEM."""
    h = jnp.dot(x_ref[...], w1_ref[...], preferred_element_type=jnp.float32) + b1_ref[...]
    h = jnp.maximum(h, 0.0).astype(jnp.bfloat16)
    h = jnp.dot(h, w2_ref[...], preferred_element_type=jnp.float32) + b2_ref[...]
    h = jnp.maximum(h, 0.0).astype(jnp.bfloat16)
    o_ref[...] = jnp.dot(h, w3_ref[...], preferred_element_type=jnp.float32) + b3_ref[...]


def fc_stack(x, w1, b1, w2, b2, w3, b3):
    """x: [B, K] bf16 -> logits [B, 10] f32."""
    B, K = x.shape
    N1, N2, N3 = w1.shape[1], w2.shape[1], w3.shape[1]
    tb = _batch_tile(B, _FC_TILE_ROWS)
    full = lambda shape: pl.BlockSpec(shape, lambda i: (0, 0))

    weight_bytes = (K * N1 + N1 * N2 + N2 * N3) * 2 + (N1 + N2 + N3) * 4
    cost = pl.CostEstimate(
        flops=2 * B * (K * N1 + N1 * N2 + N2 * N3),
        transcendentals=0,
        bytes_accessed=B * K * 2 + weight_bytes + B * N3 * 4)

    return pl.pallas_call(
        _fc_stack_kernel,
        out_shape=jax.ShapeDtypeStruct((B, N3), jnp.float32),
        grid=(pl.cdiv(B, tb),),
        in_specs=[
            pl.BlockSpec((tb, K), lambda i: (i, 0)),
            full((K, N1)), full((1, N1)),
            full((N1, N2)), full((1, N2)),
            full((N2, N3)), full((1, N3)),
        ],
        out_specs=pl.BlockSpec((tb, N3), lambda i: (i, 0)),
        compiler_params=pltpu.CompilerParams(
            dimension_semantics=("parallel",),
            vmem_limit_bytes=32 << 20),
        cost_estimate=cost,
    )(x, w1, b1.reshape(1, N1), w2, b2.reshape(1, N2), w3, b3.reshape(1, N3))


# ------------------------------ JAX glue -------------------------------------

def _phase_im2col(x, kh, kw):
    """x: [B,H,W,C] -> [4, B*(PH*PW), kh*kw*C] bf16 phase-separated im2col patches.

    Phase p = 2*di + dj (outermost) holds the im2col rows of conv outputs at
    (2i+di, 2j+dj), i.e. the 4 members of each 2x2 pooling window; feature order
    is (ki, kj, c), matching the HWIO-flattened weight made by prepare_params.
    Row order within a phase is (image, i*PW + j), so batch tiles of TB images
    occupy contiguous TB*PH*PW-row slabs.
    """
    B, H, W, C = x.shape
    OH, OW = H - kh + 1, W - kw + 1
    PH, PW = OH // 2, OW // 2
    xb = x.astype(jnp.bfloat16)
    phases = []
    for di in (0, 1):
        for dj in (0, 1):
            cols = [xb[:, di + ki: di + ki + 2 * PH: 2,
                       dj + kj: dj + kj + 2 * PW: 2, :]
                    for ki in range(kh) for kj in range(kw)]
            phases.append(jnp.concatenate(cols, axis=-1)
                          .reshape(B * PH * PW, kh * kw * C))
    return jnp.stack(phases, axis=0)


def init_params(key):
    """Deterministic random parameters in PyTorch layout (Net's shapes)."""
    ks = jax.random.split(key, 10)
    s = 0.05
    return {
        "conv1_w": s * jax.random.normal(ks[0], (6, 3, 5, 5), jnp.float32),
        "conv1_b": s * jax.random.normal(ks[1], (6,), jnp.float32),
        "conv2_w": s * jax.random.normal(ks[2], (16, 6, 5, 5), jnp.float32),
        "conv2_b": s * jax.random.normal(ks[3], (16,), jnp.float32),
        "fc1_w": s * jax.random.normal(ks[4], (120, 400), jnp.float32),
        "fc1_b": s * jax.random.normal(ks[5], (120,), jnp.float32),
        "fc2_w": s * jax.random.normal(ks[6], (84, 120), jnp.float32),
        "fc2_b": s * jax.random.normal(ks[7], (84,), jnp.float32),
        "fc3_w": s * jax.random.normal(ks[8], (10, 84), jnp.float32),
        "fc3_b": s * jax.random.normal(ks[9], (10,), jnp.float32),
    }


def prepare_params(p):
    """One-time conversion of PyTorch-layout weights to kernel layouts (baked in)."""
    def conv_w(w):  # [Cout,Cin,KH,KW] -> HWIO-flattened [KH*KW*Cin, Cout] bf16
        co, ci, kh, kw = w.shape
        return jnp.transpose(w, (2, 3, 1, 0)).reshape(kh * kw * ci, co).astype(jnp.bfloat16)

    # fc1 consumes our (h, w, c)-ordered flatten instead of PyTorch's (c, h, w):
    # permute its rows once here instead of transposing the activation per call.
    fw1 = jnp.transpose(p["fc1_w"].reshape(120, 16, 5, 5), (2, 3, 1, 0))
    fw1 = fw1.reshape(400, 120).astype(jnp.bfloat16)
    return {
        "w1": conv_w(p["conv1_w"]), "b1": p["conv1_b"],
        "w2": conv_w(p["conv2_w"]), "b2": p["conv2_b"],
        "fw1": fw1, "fb1": p["fc1_b"],
        "fw2": jnp.transpose(p["fc2_w"]).astype(jnp.bfloat16), "fb2": p["fc2_b"],
        "fw3": jnp.transpose(p["fc3_w"]).astype(jnp.bfloat16), "fb3": p["fc3_b"],
    }


def net_forward(x_nchw, kp):
    """x_nchw: [B, 3, 32, 32] f32 -> logits [B, 10] f32 (matches Net.forward)."""
    B = x_nchw.shape[0]
    x = jnp.transpose(x_nchw, (0, 2, 3, 1))                        # NHWC [B,32,32,3]

    # conv1 + ReLU + 2x2 maxpool (single fused, batch-tiled kernel): [B*196, 6] bf16
    y = conv_relu_pool(_phase_im2col(x, 5, 5), kp["w1"], kp["b1"], m_per_image=14 * 14)
    y = y.reshape(B, 14, 14, 6)

    # conv2 + ReLU + 2x2 maxpool (single fused, batch-tiled kernel): [B*25, 16] bf16
    y = conv_relu_pool(_phase_im2col(y, 5, 5), kp["w2"], kp["b2"], m_per_image=5 * 5)

    # flatten in (h, w, c) order; fc1 weight rows were permuted at init to match.
    y = y.reshape(B, 400)

    # fc1 -> ReLU -> fc2 -> ReLU -> fc3 (single fused kernel, bf16 input)
    return fc_stack(y, kp["fw1"], kp["fb1"], kp["fw2"], kp["fb2"],
                    kp["fw3"], kp["fb3"])


if __name__ == "__main__":
    key = jax.random.PRNGKey(0)
    k_x, k_p = jax.random.split(key)
    # Net's fc1 expects 16*5*5 features => 32x32 spatial input.
    x = jax.random.normal(k_x, (2, 3, 32, 32), jnp.float32)
    params = prepare_params(init_params(k_p))

    fwd = jax.jit(net_forward)
    out = jax.block_until_ready(fwd(x, params))
    assert out.shape == (2, 10) and out.dtype == jnp.float32
    print("KERNEL_OK")
</pallas_src>

<mosaic_0001>
module attributes {stable_mosaic.version = 11 : i64} {
  func.func @_conv_pool_kernel(%arg0: i32, %arg1: memref<4x392x75xbf16, #tpu.memory_space<vmem>>, %arg2: memref<75x6xbf16, #tpu.memory_space<vmem>>, %arg3: memref<1x6xf32, #tpu.memory_space<vmem>>, %arg4: memref<392x6xbf16, #tpu.memory_space<vmem>>) attributes {dimension_semantics = [#tpu.dimension_semantics<parallel>], iteration_bounds = array<i64: 1>, scalar_prefetch = 0 : i64, scratch_operands = 0 : i64, tpu.core_type = #tpu.core_type<tc>, window_params = [{transform_indices = @transform_0, window_bounds = array<i64: 4, 392, 75>}, {pipeline_mode = #tpu.pipeline_mode<synchronous>, transform_indices = @transform_1, window_bounds = array<i64: 75, 6>}, {pipeline_mode = #tpu.pipeline_mode<synchronous>, transform_indices = @transform_2, window_bounds = array<i64: 1, 6>}, {transform_indices = @transform_3, window_bounds = array<i64: 392, 6>}]} {
    %c0 = arith.constant 0 : index
    %c0_0 = arith.constant 0 : index
    %0 = vector.load %arg2[%c0, %c0_0] : memref<75x6xbf16, #tpu.memory_space<vmem>>, vector<75x6xbf16>
    %c0_1 = arith.constant 0 : index
    %c0_2 = arith.constant 0 : index
    %c0_3 = arith.constant 0 : index
    %1 = vector.load %arg1[%c0_1, %c0_2, %c0_3] : memref<4x392x75xbf16, #tpu.memory_space<vmem>>, vector<1x392x75xbf16>
    %2 = vector.shape_cast %1 : vector<1x392x75xbf16> to vector<392x75xbf16>
    %cst = arith.constant dense<0.000000e+00> : vector<392x6xf32>
    %3 = tpu.matmul %2, %0, %cst {dimension_numbers = #tpu.dot_dimension_numbers<[1], [0], [0], [1], [0, 0, 1, 1], [], []>} : vector<392x75xbf16>, vector<75x6xbf16>, vector<392x6xf32> -> vector<392x6xf32>
    %c1 = arith.constant 1 : index
    %c0_4 = arith.constant 0 : index
    %c0_5 = arith.constant 0 : index
    %4 = vector.load %arg1[%c1, %c0_4, %c0_5] : memref<4x392x75xbf16, #tpu.memory_space<vmem>>, vector<1x392x75xbf16>
    %5 = vector.shape_cast %4 : vector<1x392x75xbf16> to vector<392x75xbf16>
    %cst_6 = arith.constant dense<0.000000e+00> : vector<392x6xf32>
    %6 = tpu.matmul %5, %0, %cst_6 {dimension_numbers = #tpu.dot_dimension_numbers<[1], [0], [0], [1], [0, 0, 1, 1], [], []>} : vector<392x75xbf16>, vector<75x6xbf16>, vector<392x6xf32> -> vector<392x6xf32>
    %7 = arith.maximumf %3, %6 : vector<392x6xf32>
    %c2 = arith.constant 2 : index
    %c0_7 = arith.constant 0 : index
    %c0_8 = arith.constant 0 : index
    %8 = vector.load %arg1[%c2, %c0_7, %c0_8] : memref<4x392x75xbf16, #tpu.memory_space<vmem>>, vector<1x392x75xbf16>
    %9 = vector.shape_cast %8 : vector<1x392x75xbf16> to vector<392x75xbf16>
    %cst_9 = arith.constant dense<0.000000e+00> : vector<392x6xf32>
    %10 = tpu.matmul %9, %0, %cst_9 {dimension_numbers = #tpu.dot_dimension_numbers<[1], [0], [0], [1], [0, 0, 1, 1], [], []>} : vector<392x75xbf16>, vector<75x6xbf16>, vector<392x6xf32> -> vector<392x6xf32>
    %11 = arith.maximumf %7, %10 : vector<392x6xf32>
    %c3 = arith.constant 3 : index
    %c0_10 = arith.constant 0 : index
    %c0_11 = arith.constant 0 : index
    %12 = vector.load %arg1[%c3, %c0_10, %c0_11] : memref<4x392x75xbf16, #tpu.memory_space<vmem>>, vector<1x392x75xbf16>
    %13 = vector.shape_cast %12 : vector<1x392x75xbf16> to vector<392x75xbf16>
    %cst_12 = arith.constant dense<0.000000e+00> : vector<392x6xf32>
    %14 = tpu.matmul %13, %0, %cst_12 {dimension_numbers = #tpu.dot_dimension_numbers<[1], [0], [0], [1], [0, 0, 1, 1], [], []>} : vector<392x75xbf16>, vector<75x6xbf16>, vector<392x6xf32> -> vector<392x6xf32>
    %15 = arith.maximumf %11, %14 : vector<392x6xf32>
    %c0_13 = arith.constant 0 : index
    %c0_14 = arith.constant 0 : index
    %16 = vector.load %arg3[%c0_13, %c0_14] : memref<1x6xf32, #tpu.memory_space<vmem>>, vector<1x6xf32>
    %17 = vector.broadcast %16 : vector<1x6xf32> to vector<392x6xf32>
    %18 = arith.addf %15, %17 : vector<392x6xf32>
    %cst_15 = arith.constant 0.000000e+00 : f32
    %19 = vector.broadcast %cst_15 : f32 to vector<392x6xf32>
    %20 = arith.maximumf %18, %19 : vector<392x6xf32>
    %21 = arith.truncf %20 : vector<392x6xf32> to vector<392x6xbf16>
    %c0_16 = arith.constant 0 : index
    %c0_17 = arith.constant 0 : index
    %22 = vector.load %arg4[%c0_16, %c0_17] : memref<392x6xbf16, #tpu.memory_space<vmem>>, vector<392x6xbf16>
    tpu.vector_store %arg4[%c0_16, %c0_17], %21 {strides = array<i32>} : memref<392x6xbf16, #tpu.memory_space<vmem>>, vector<392x6xbf16>,
    return
  }
  func.func @transform_0(%arg0: i32) -> (i32, i32, i32) {
    %c0_i32 = arith.constant 0 : i32
    %c0_i32_0 = arith.constant 0 : i32
    %c0_i32_1 = arith.constant 0 : i32
    return %c0_i32, %arg0, %c0_i32_0 : i32, i32, i32
  }
  func.func @transform_1(%arg0: i32) -> (i32, i32) {
    %c0_i32 = arith.constant 0 : i32
    %c0_i32_0 = arith.constant 0 : i32
    %c0_i32_1 = arith.constant 0 : i32
    return %c0_i32, %c0_i32_0 : i32, i32
  }
  func.func @transform_2(%arg0: i32) -> (i32, i32) {
    %c0_i32 = arith.constant 0 : i32
    %c0_i32_0 = arith.constant 0 : i32
    %c0_i32_1 = arith.constant 0 : i32
    return %c0_i32, %c0_i32_0 : i32, i32
  }
  func.func @transform_3(%arg0: i32) -> (i32, i32) {
    %c0_i32 = arith.constant 0 : i32
    %c0_i32_0 = arith.constant 0 : i32
    return %arg0, %c0_i32 : i32, i32
  }
}

module attributes {stable_mosaic.version = 11 : i64} {
  func.func @_conv_pool_kernel(%arg0: i32, %arg1: memref<4x50x150xbf16, #tpu.memory_space<vmem>>, %arg2: memref<150x16xbf16, #tpu.memory_space<vmem>>, %arg3: memref<1x16xf32, #tpu.memory_space<vmem>>, %arg4: memref<50x16xbf16, #tpu.memory_space<vmem>>) attributes {dimension_semantics = [#tpu.dimension_semantics<parallel>], iteration_bounds = array<i64: 1>, scalar_prefetch = 0 : i64, scratch_operands = 0 : i64, tpu.core_type = #tpu.core_type<tc>, window_params = [{transform_indices = @transform_0, window_bounds = array<i64: 4, 50, 150>}, {pipeline_mode = #tpu.pipeline_mode<synchronous>, transform_indices = @transform_1, window_bounds = array<i64: 150, 16>}, {pipeline_mode = #tpu.pipeline_mode<synchronous>, transform_indices = @transform_2, window_bounds = array<i64: 1, 16>}, {transform_indices = @transform_3, window_bounds = array<i64: 50, 16>}]} {
    %c0 = arith.constant 0 : index
    %c0_0 = arith.constant 0 : index
    %0 = vector.load %arg2[%c0, %c0_0] : memref<150x16xbf16, #tpu.memory_space<vmem>>, vector<150x16xbf16>
    %c0_1 = arith.constant 0 : index
    %c0_2 = arith.constant 0 : index
    %c0_3 = arith.constant 0 : index
    %1 = vector.load %arg1[%c0_1, %c0_2, %c0_3] : memref<4x50x150xbf16, #tpu.memory_space<vmem>>, vector<1x50x150xbf16>
    %2 = vector.shape_cast %1 : vector<1x50x150xbf16> to vector<50x150xbf16>
    %cst = arith.constant dense<0.000000e+00> : vector<50x16xf32>
    %3 = tpu.matmul %2, %0, %cst {dimension_numbers = #tpu.dot_dimension_numbers<[1], [0], [0], [1], [0, 0, 1, 1], [], []>} : vector<50x150xbf16>, vector<150x16xbf16>, vector<50x16xf32> -> vector<50x16xf32>
    %c1 = arith.constant 1 : index
    %c0_4 = arith.constant 0 : index
    %c0_5 = arith.constant 0 : index
    %4 = vector.load %arg1[%c1, %c0_4, %c0_5] : memref<4x50x150xbf16, #tpu.memory_space<vmem>>, vector<1x50x150xbf16>
    %5 = vector.shape_cast %4 : vector<1x50x150xbf16> to vector<50x150xbf16>
    %cst_6 = arith.constant dense<0.000000e+00> : vector<50x16xf32>
    %6 = tpu.matmul %5, %0, %cst_6 {dimension_numbers = #tpu.dot_dimension_numbers<[1], [0], [0], [1], [0, 0, 1, 1], [], []>} : vector<50x150xbf16>, vector<150x16xbf16>, vector<50x16xf32> -> vector<50x16xf32>
    %7 = arith.maximumf %3, %6 : vector<50x16xf32>
    %c2 = arith.constant 2 : index
    %c0_7 = arith.constant 0 : index
    %c0_8 = arith.constant 0 : index
    %8 = vector.load %arg1[%c2, %c0_7, %c0_8] : memref<4x50x150xbf16, #tpu.memory_space<vmem>>, vector<1x50x150xbf16>
    %9 = vector.shape_cast %8 : vector<1x50x150xbf16> to vector<50x150xbf16>
    %cst_9 = arith.constant dense<0.000000e+00> : vector<50x16xf32>
    %10 = tpu.matmul %9, %0, %cst_9 {dimension_numbers = #tpu.dot_dimension_numbers<[1], [0], [0], [1], [0, 0, 1, 1], [], []>} : vector<50x150xbf16>, vector<150x16xbf16>, vector<50x16xf32> -> vector<50x16xf32>
    %11 = arith.maximumf %7, %10 : vector<50x16xf32>
    %c3 = arith.constant 3 : index
    %c0_10 = arith.constant 0 : index
    %c0_11 = arith.constant 0 : index
    %12 = vector.load %arg1[%c3, %c0_10, %c0_11] : memref<4x50x150xbf16, #tpu.memory_space<vmem>>, vector<1x50x150xbf16>
    %13 = vector.shape_cast %12 : vector<1x50x150xbf16> to vector<50x150xbf16>
    %cst_12 = arith.constant dense<0.000000e+00> : vector<50x16xf32>
    %14 = tpu.matmul %13, %0, %cst_12 {dimension_numbers = #tpu.dot_dimension_numbers<[1], [0], [0], [1], [0, 0, 1, 1], [], []>} : vector<50x150xbf16>, vector<150x16xbf16>, vector<50x16xf32> -> vector<50x16xf32>
    %15 = arith.maximumf %11, %14 : vector<50x16xf32>
    %c0_13 = arith.constant 0 : index
    %c0_14 = arith.constant 0 : index
    %16 = vector.load %arg3[%c0_13, %c0_14] : memref<1x16xf32, #tpu.memory_space<vmem>>, vector<1x16xf32>
    %17 = vector.broadcast %16 : vector<1x16xf32> to vector<50x16xf32>
    %18 = arith.addf %15, %17 : vector<50x16xf32>
    %cst_15 = arith.constant 0.000000e+00 : f32
    %19 = vector.broadcast %cst_15 : f32 to vector<50x16xf32>
    %20 = arith.maximumf %18, %19 : vector<50x16xf32>
    %21 = arith.truncf %20 : vector<50x16xf32> to vector<50x16xbf16>
    %c0_16 = arith.constant 0 : index
    %c0_17 = arith.constant 0 : index
    %22 = vector.load %arg4[%c0_16, %c0_17] : memref<50x16xbf16, #tpu.memory_space<vmem>>, vector<50x16xbf16>
    tpu.vector_store %arg4[%c0_16, %c0_17], %21 {strides = array<i32>} : memref<50x16xbf16, #tpu.memory_space<vmem>>, vector<50x16xbf16>,
    return
  }
  func.func @transform_0(%arg0: i32) -> (i32, i32, i32) {
    %c0_i32 = arith.constant 0 : i32
    %c0_i32_0 = arith.constant 0 : i32
    %c0_i32_1 = arith.constant 0 : i32
    return %c0_i32, %arg0, %c0_i32_0 : i32, i32, i32
  }
  func.func @transform_1(%arg0: i32) -> (i32, i32) {
    %c0_i32 = arith.constant 0 : i32
    %c0_i32_0 = arith.constant 0 : i32
    %c0_i32_1 = arith.constant 0 : i32
    return %c0_i32, %c0_i32_0 : i32, i32
  }
  func.func @transform_2(%arg0: i32) -> (i32, i32) {
    %c0_i32 = arith.constant 0 : i32
    %c0_i32_0 = arith.constant 0 : i32
    %c0_i32_1 = arith.constant 0 : i32
    return %c0_i32, %c0_i32_0 : i32, i32
  }
  func.func @transform_3(%arg0: i32) -> (i32, i32) {
    %c0_i32 = arith.constant 0 : i32
    %c0_i32_0 = arith.constant 0 : i32
    return %arg0, %c0_i32 : i32, i32
  }
}

module attributes {stable_mosaic.version = 11 : i64} {
  func.func @_fc_stack_kernel(%arg0: i32, %arg1: memref<2x400xbf16, #tpu.memory_space<vmem>>, %arg2: memref<400x120xbf16, #tpu.memory_space<vmem>>, %arg3: memref<1x120xf32, #tpu.memory_space<vmem>>, %arg4: memref<120x84xbf16, #tpu.memory_space<vmem>>, %arg5: memref<1x84xf32, #tpu.memory_space<vmem>>, %arg6: memref<84x10xbf16, #tpu.memory_space<vmem>>, %arg7: memref<1x10xf32, #tpu.memory_space<vmem>>, %arg8: memref<2x10xf32, #tpu.memory_space<vmem>>) attributes {dimension_semantics = [#tpu.dimension_semantics<parallel>], iteration_bounds = array<i64: 1>, scalar_prefetch = 0 : i64, scratch_operands = 0 : i64, tpu.core_type = #tpu.core_type<tc>, window_params = [{transform_indices = @transform_0, window_bounds = array<i64: 2, 400>}, {pipeline_mode = #tpu.pipeline_mode<synchronous>, transform_indices = @transform_1, window_bounds = array<i64: 400, 120>}, {pipeline_mode = #tpu.pipeline_mode<synchronous>, transform_indices = @transform_2, window_bounds = array<i64: 1, 120>}, {pipeline_mode = #tpu.pipeline_mode<synchronous>, transform_indices = @transform_3, window_bounds = array<i64: 120, 84>}, {pipeline_mode = #tpu.pipeline_mode<synchronous>, transform_indices = @transform_4, window_bounds = array<i64: 1, 84>}, {pipeline_mode = #tpu.pipeline_mode<synchronous>, transform_indices = @transform_5, window_bounds = array<i64: 84, 10>}, {pipeline_mode = #tpu.pipeline_mode<synchronous>, transform_indices = @transform_6, window_bounds = array<i64: 1, 10>}, {transform_indices = @transform_7, window_bounds = array<i64: 2, 10>}]} {
    %c0 = arith.constant 0 : index
    %c0_0 = arith.constant 0 : index
    %0 = vector.load %arg1[%c0, %c0_0] : memref<2x400xbf16, #tpu.memory_space<vmem>>, vector<2x400xbf16>
    %c0_1 = arith.constant 0 : index
    %c0_2 = arith.constant 0 : index
    %1 = vector.load %arg2[%c0_1, %c0_2] : memref<400x120xbf16, #tpu.memory_space<vmem>>, vector<400x120xbf16>
    %cst = arith.constant dense<0.000000e+00> : vector<2x120xf32>
    %2 = tpu.matmul %0, %1, %cst {dimension_numbers = #tpu.dot_dimension_numbers<[1], [0], [0], [1], [0, 0, 1, 1], [], []>} : vector<2x400xbf16>, vector<400x120xbf16>, vector<2x120xf32> -> vector<2x120xf32>
    %c0_3 = arith.constant 0 : index
    %c0_4 = arith.constant 0 : index
    %3 = vector.load %arg3[%c0_3, %c0_4] : memref<1x120xf32, #tpu.memory_space<vmem>>, vector<1x120xf32>
    %4 = vector.broadcast %3 : vector<1x120xf32> to vector<2x120xf32>
    %5 = arith.addf %2, %4 : vector<2x120xf32>
    %cst_5 = arith.constant 0.000000e+00 : f32
    %6 = vector.broadcast %cst_5 : f32 to vector<2x120xf32>
    %7 = arith.maximumf %5, %6 : vector<2x120xf32>
    %8 = arith.truncf %7 : vector<2x120xf32> to vector<2x120xbf16>
    %c0_6 = arith.constant 0 : index
    %c0_7 = arith.constant 0 : index
    %9 = vector.load %arg4[%c0_6, %c0_7] : memref<120x84xbf16, #tpu.memory_space<vmem>>, vector<120x84xbf16>
    %cst_8 = arith.constant dense<0.000000e+00> : vector<2x84xf32>
    %10 = tpu.matmul %8, %9, %cst_8 {dimension_numbers = #tpu.dot_dimension_numbers<[1], [0], [0], [1], [0, 0, 1, 1], [], []>} : vector<2x120xbf16>, vector<120x84xbf16>, vector<2x84xf32> -> vector<2x84xf32>
    %c0_9 = arith.constant 0 : index
    %c0_10 = arith.constant 0 : index
    %11 = vector.load %arg5[%c0_9, %c0_10] : memref<1x84xf32, #tpu.memory_space<vmem>>, vector<1x84xf32>
    %12 = vector.broadcast %11 : vector<1x84xf32> to vector<2x84xf32>
    %13 = arith.addf %10, %12 : vector<2x84xf32>
    %cst_11 = arith.constant 0.000000e+00 : f32
    %14 = vector.broadcast %cst_11 : f32 to vector<2x84xf32>
    %15 = arith.maximumf %13, %14 : vector<2x84xf32>
    %16 = arith.truncf %15 : vector<2x84xf32> to vector<2x84xbf16>
    %c0_12 = arith.constant 0 : index
    %c0_13 = arith.constant 0 : index
    %17 = vector.load %arg6[%c0_12, %c0_13] : memref<84x10xbf16, #tpu.memory_space<vmem>>, vector<84x10xbf16>
    %cst_14 = arith.constant dense<0.000000e+00> : vector<2x10xf32>
    %18 = tpu.matmul %16, %17, %cst_14 {dimension_numbers = #tpu.dot_dimension_numbers<[1], [0], [0], [1], [0, 0, 1, 1], [], []>} : vector<2x84xbf16>, vector<84x10xbf16>, vector<2x10xf32> -> vector<2x10xf32>
    %c0_15 = arith.constant 0 : index
    %c0_16 = arith.constant 0 : index
    %19 = vector.load %arg7[%c0_15, %c0_16] : memref<1x10xf32, #tpu.memory_space<vmem>>, vector<1x10xf32>
    %20 = vector.broadcast %19 : vector<1x10xf32> to vector<2x10xf32>
    %21 = arith.addf %18, %20 : vector<2x10xf32>
    %c0_17 = arith.constant 0 : index
    %c0_18 = arith.constant 0 : index
    %22 = vector.load %arg8[%c0_17, %c0_18] : memref<2x10xf32, #tpu.memory_space<vmem>>, vector<2x10xf32>
    tpu.vector_store %arg8[%c0_17, %c0_18], %21 {strides = array<i32>} : memref<2x10xf32, #tpu.memory_space<vmem>>, vector<2x10xf32>,
    return
  }
  func.func @transform_0(%arg0: i32) -> (i32, i32) {
    %c0_i32 = arith.constant 0 : i32
    %c0_i32_0 = arith.constant 0 : i32
    return %arg0, %c0_i32 : i32, i32
  }
  func.func @transform_1(%arg0: i32) -> (i32, i32) {
    %c0_i32 = arith.constant 0 : i32
    %c0_i32_0 = arith.constant 0 : i32
    %c0_i32_1 = arith.constant 0 : i32
    return %c0_i32, %c0_i32_0 : i32, i32
  }
  func.func @transform_2(%arg0: i32) -> (i32, i32) {
    %c0_i32 = arith.constant 0 : i32
    %c0_i32_0 = arith.constant 0 : i32
    %c0_i32_1 = arith.constant 0 : i32
    return %c0_i32, %c0_i32_0 : i32, i32
  }
  func.func @transform_3(%arg0: i32) -> (i32, i32) {
    %c0_i32 = arith.constant 0 : i32
    %c0_i32_0 = arith.constant 0 : i32
    %c0_i32_1 = arith.constant 0 : i32
    return %c0_i32, %c0_i32_0 : i32, i32
  }
  func.func @transform_4(%arg0: i32) -> (i32, i32) {
    %c0_i32 = arith.constant 0 : i32
    %c0_i32_0 = arith.constant 0 : i32
    %c0_i32_1 = arith.constant 0 : i32
    return %c0_i32, %c0_i32_0 : i32, i32
  }
  func.func @transform_5(%arg0: i32) -> (i32, i32) {
    %c0_i32 = arith.constant 0 : i32
    %c0_i32_0 = arith.constant 0 : i32
    %c0_i32_1 = arith.constant 0 : i32
    return %c0_i32, %c0_i32_0 : i32, i32
  }
  func.func @transform_6(%arg0: i32) -> (i32, i32) {
    %c0_i32 = arith.constant 0 : i32
    %c0_i32_0 = arith.constant 0 : i32
    %c0_i32_1 = arith.constant 0 : i32
    return %c0_i32, %c0_i32_0 : i32, i32
  }
  func.func @transform_7(%arg0: i32) -> (i32, i32) {
    %c0_i32 = arith.constant 0 : i32
    %c0_i32_0 = arith.constant 0 : i32
    return %arg0, %c0_i32 : i32, i32
  }
}

</mosaic_0001>

<bundles_post_ra>
// kernel: net_forward.3
= control target key start
LH: loop header
LB: loop body
LE: loop exit
PB: predicated region body
PF: predicated region fallthrough
CT: control target
= control target key end

     0   :  { %v4956_v0 = vmov 0.0   ;;  %vm3604_vm0 = vmmov 0   ;;  %vm302_vm1 = vcmask 1044480   ;;  %vm303_vm2 = vcmask 1045504   ;;  %s4952_s1 = inlined_call_operand.vmem [shape: bf16[75,6], index: 1, kind: input, shape index: {}]   ;;  %s4953_s0 = inlined_call_operand.vmem [shape: bf16[4,392,75], index: 0, kind: input, shape index: {}]   ;;  %s4954_s2 = inlined_call_operand.vmem [shape: f32[1,6], index: 2, kind: input, shape index: {}]   ;;  %s4955_s3 = inlined_call_operand.vmem [shape: bf16[392,6], index: 3, kind: output, shape index: {}]  }
   0x1   :  { %3055 = vmatprep.subr.bf16.mxu0 %v4956_v0  ;;  %3165 = vmatprep.subr.bf16.mxu1 %v4956_v0  ;;  %v3498_v1 = vld [vmem:[%s4952_s1] sm:$0xff]   ;;  %v3499_v2 = vld [vmem:[%s4952_s1 + $0x8] sm:$0xff]   ;;  %v3500_v3 = vld [vmem:[%s4952_s1 + $0x10] sm:$0xff]   ;;  %v3605_v4 = vmov 65535   ;;  %vm226_vm3 = vcmask 613376   ;;  %vm2430_vm4 = vcmask 44032  }
   0x2   :  { %3056 = vmatpush3.bf16.msra.mxu0 %v3498_v1  ;;  %3166 = vmatpush3.bf16.msra.mxu1 %v3498_v1  ;;  %v304_v5 = vsel %vm302_vm1, 4294967295, %v3605_v4  ;;  %v3501_v6 = vld [vmem:[%s4952_s1 + $0x18] sm:$0xff]   ;;  %v3502_v7 = vld [vmem:[%s4952_s1 + $0x20] sm:$0x3f]   ;;  %v3505_v12 = vld [vmem:[%s4953_s0 + $0x8] sm:$0xff]  }
   0x3   :  { %3057 = vmatprep.subr.bf16.mxu0 %v4956_v0  ;;  %3167 = vmatprep.subr.bf16.mxu1 %v4956_v0  ;;  %v305_v8 = vsel %vm303_vm2, %v304_v5, 0  ;;  %v3503_v10 = vld [vmem:[%s4953_s0] sm:$0xff]   ;;  %v3506_v13 = vld [vmem:[%s4953_s0 + $0xcc] sm:$0xff]   ;;  %v3508_v15 = vld [vmem:[%s4953_s0 + $0xd4] sm:$0xff]  }
   0x4   :  { %3065 = vmatprep.mubr.msk.bf16.mxu0 %vm3604_vm0, %v4956_v0  ;;  %3175 = vmatprep.mubr.msk.bf16.mxu1 %vm3604_vm0, %v4956_v0  ;;  %v307_v9 = vand.u32 %v3502_v7, %v305_v8  ;;  %v3504_v11 = vld [vmem:[%s4953_s0 + $0xc4] sm:$0xff]   ;;  %v3507_v14 = vld [vmem:[%s4953_s0 + $0x10] sm:$0xff]   ;;  %v3509_v16 = vld [vmem:[%s4953_s0 + $0x18] sm:$0xff]  }
   0x5   :  { %v3510_v17 = vld [vmem:[%s4953_s0 + $0xdc] sm:$0xff]   ;;  %v3512_v19 = vld [vmem:[%s4953_s0 + $0xe4] sm:$0xff]   ;;  %v3514_v21 = vld [vmem:[%s4953_s0 + $0xec] sm:$0xff]  }
   0x6   :  { %3058 = vmatpush3.bf16.msra.mxu0 %v3499_v2  ;;  %3168 = vmatpush3.bf16.msra.mxu1 %v3499_v2  ;;  %v3511_v18 = vld [vmem:[%s4953_s0 + $0x20] sm:$0xff]   ;;  %v3513_v20 = vld [vmem:[%s4953_s0 + $0x28] sm:$0xff]   ;;  %v3515_v22 = vld [vmem:[%s4953_s0 + $0x30] sm:$0xff]  }
   0x7   :  { %3059 = vmatprep.subr.bf16.mxu0 %v4956_v0  ;;  %3169 = vmatprep.subr.bf16.mxu1 %v4956_v0  ;;  %v3516_v23 = vld [vmem:[%s4953_s0 + $0xf4] sm:$0xff]   ;;  %v3518_v25 = vld [vmem:[%s4953_s0 + $0xfc] sm:$0xff]   ;;  %v3520_v27 = vld [vmem:[%s4953_s0 + $0x104] sm:$0xff]  }
   0x8   :  { %v3517_v24 = vld [vmem:[%s4953_s0 + $0x38] sm:$0xff]   ;;  %v3519_v26 = vld [vmem:[%s4953_s0 + $0x40] sm:$0xff]   ;;  %v3521_v28 = vld [vmem:[%s4953_s0 + $0x48] sm:$0xff]  }
   0x9   :  { %v3522_v29 = vld [vmem:[%s4953_s0 + $0x10c] sm:$0xff]   ;;  %v3524_v31 = vld [vmem:[%s4953_s0 + $0x114] sm:$0xff]   ;;  %v3526_v33 = vld [vmem:[%s4953_s0 + $0x11c] sm:$0xff]  }
   0xa   :  { %3060 = vmatpush3.bf16.msra.mxu0 %v3500_v3  ;;  %3170 = vmatpush3.bf16.msra.mxu1 %v3500_v3  ;;  %v3523_v30 = vld [vmem:[%s4953_s0 + $0x50] sm:$0xff]   ;;  %v3525_v32 = vld [vmem:[%s4953_s0 + $0x58] sm:$0xff]   ;;  %v3527_v34 = vld [vmem:[%s4953_s0 + $0x60] sm:$0xff]  }
   0xb   :  { %3061 = vmatprep.subr.bf16.mxu0 %v4956_v0  ;;  %3171 = vmatprep.subr.bf16.mxu1 %v4956_v0  ;;  %v3528_v35 = vld [vmem:[%s4953_s0 + $0x124] sm:$0xff]   ;;  %v3530_v37 = vld [vmem:[%s4953_s0 + $0x12c] sm:$0xff]   ;;  %v3532_v39 = vld [vmem:[%s4953_s0 + $0x134] sm:$0xff]  }
   0xc   :  { %v3529_v36 = vld [vmem:[%s4953_s0 + $0x68] sm:$0xff]   ;;  %v3531_v38 = vld [vmem:[%s4953_s0 + $0x70] sm:$0xff]   ;;  %v3533_v40 = vld [vmem:[%s4953_s0 + $0x78] sm:$0xff]  }
   0xd   :  { %v3534_v41 = vld [vmem:[%s4953_s0 + $0x13c] sm:$0xff]   ;;  %v3536_v43 = vld [vmem:[%s4953_s0 + $0x144] sm:$0xff]   ;;  %v3538_v45 = vld [vmem:[%s4953_s0 + $0x14c] sm:$0xff]  }
   0xe   :  { %3062 = vmatpush3.bf16.msra.mxu0 %v3501_v6  ;;  %3172 = vmatpush3.bf16.msra.mxu1 %v3501_v6  ;;  %v3535_v42 = vld [vmem:[%s4953_s0 + $0x80] sm:$0xff]   ;;  %v3537_v44 = vld [vmem:[%s4953_s0 + $0x88] sm:$0xff]   ;;  %v3539_v46 = vld [vmem:[%s4953_s0 + $0x90] sm:$0xff]  }
   0xf   :  { %3063 = vmatprep.subr.bf16.mxu0 %v4956_v0  ;;  %3173 = vmatprep.subr.bf16.mxu1 %v4956_v0  ;;  %v3540_v47 = vld [vmem:[%s4953_s0 + $0x154] sm:$0xff]   ;;  %v3542_v49 = vld [vmem:[%s4953_s0 + $0x15c] sm:$0xff]   ;;  %v3544_v51 = vld [vmem:[%s4953_s0 + $0x164] sm:$0xff]  }
  0x10   :  { %v3541_v48 = vld [vmem:[%s4953_s0 + $0x98] sm:$0xff]   ;;  %v3543_v50 = vld [vmem:[%s4953_s0 + $0xa0] sm:$0xff]   ;;  %v3545_v52 = vld [vmem:[%s4953_s0 + $0xa8] sm:$0xff]  }
  0x11   :  { %v3546_v53 = vld [vmem:[%s4953_s0 + $0x16c] sm:$0xff]   ;;  %v3548_v55 = vld [vmem:[%s4953_s0 + $0x174] sm:$0xff]   ;;  %v3550_v57 = vld [vmem:[%s4953_s0 + $0x17c] sm:$0xff]  }
  0x12   :  { %3064 = vmatpush3.bf16.msra.mxu0 %v307_v9  ;;  %3174 = vmatpush3.bf16.msra.mxu1 %v307_v9  ;;  %v3547_v54 = vld [vmem:[%s4953_s0 + $0xb0] sm:$0xff]   ;;  %v3549_v56 = vld [vmem:[%s4953_s0 + $0xb8] sm:$0xff]   ;;  %v3551_v58 = vld [vmem:[%s4953_s0 + $0xc0] ss:$0 sps:$4 sm:$0xff]  }
  0x13   :  { %3275 = vmatprep.subr.bf16.mxu0 %v4956_v0  ;;  %3385 = vmatprep.subr.bf16.mxu1 %v4956_v0  ;;  %v3552_v59 = vld [vmem:[%s4953_s0 + $0x184] ss:$0 sps:$4 sm:$0xff]   ;;  %v3553_v60 = vld [vmem:[%s4953_s0 + $0x188] sm:$0xff]   ;;  %v3555_v62 = vld [vmem:[%s4953_s0 + $0x190] sm:$0xff]  }
  0x14   :  { %v3554_v61 = vld [vmem:[%s4953_s0 + $0x24c] sm:$0xff]   ;;  %v3556_v63 = vld [vmem:[%s4953_s0 + $0x254] sm:$0xff]   ;;  %v3558_v7 = vld [vmem:[%s4953_s0 + $0x25c] sm:$0xff]  }
  0x15   :  { %3066 = vmatmul.mubr.msk.bf16.vlgmr.msra.gmra.mrb[0].mxu0 %vm226_vm3, %v3503_v10  ;;  %3176 = vmatmul.mubr.msk.bf16.vlgmr.msra.gmra.mrb[0].mxu1 %vm226_vm3, %v3504_v11 }
  0x16   :  { %3276 = vmatpush3.bf16.msra.mxu0 %v3498_v1  ;;  %3386 = vmatpush3.bf16.msra.mxu1 %v3498_v1 }
  0x17   :  { %3069 = vmatprep.mubr.msk.bf16.mxu0 %vm3604_vm0, %v4956_v0  ;;  %3179 = vmatprep.mubr.msk.bf16.mxu1 %vm3604_vm0, %v4956_v0 }
  0x18   :  { %3277 = vmatprep.subr.bf16.mxu0 %v4956_v0  ;;  %3387 = vmatprep.subr.bf16.mxu1 %v4956_v0 }
  0x1a   :  { %3278 = vmatpush3.bf16.msra.mxu0 %v3499_v2  ;;  %3388 = vmatpush3.bf16.msra.mxu1 %v3499_v2 }
  0x1b   :  { %3279 = vmatprep.subr.bf16.mxu0 %v4956_v0  ;;  %3389 = vmatprep.subr.bf16.mxu1 %v4956_v0 }
  0x1d   :  { %3070 = vmatmul.mubr.msk.bf16.gmra.mrb[4].mxu0 %vm226_vm3, %v3505_v12  ;;  %3180 = vmatmul.mubr.msk.bf16.gmra.mrb[4].mxu1 %vm226_vm3, %v3506_v13 }
  0x1e   :  { %3073 = vmatprep.mubr.msk.bf16.mxu0 %vm3604_vm0, %v4956_v0  ;;  %3183 = vmatprep.mubr.msk.bf16.mxu1 %vm3604_vm0, %v4956_v0 }
  0x1f   :  { %3280 = vmatpush3.bf16.msra.mxu0 %v3500_v3  ;;  %3390 = vmatpush3.bf16.msra.mxu1 %v3500_v3 }
  0x20   :  { %3281 = vmatprep.subr.bf16.mxu0 %v4956_v0  ;;  %3391 = vmatprep.subr.bf16.mxu1 %v4956_v0 }
  0x23   :  { %3282 = vmatpush3.bf16.msra.mxu0 %v3501_v6  ;;  %3392 = vmatpush3.bf16.msra.mxu1 %v3501_v6  ;;  %v3557_v6 = vld [vmem:[%s4953_s0 + $0x198] sm:$0xff]  }
  0x24   :  { %3283 = vmatprep.subr.bf16.mxu0 %v4956_v0  ;;  %3393 = vmatprep.subr.bf16.mxu1 %v4956_v0 }
  0x25   :  { %3074 = vmatmul.mubr.msk.bf16.gmra.mrb[8].mxu0 %vm226_vm3, %v3507_v14  ;;  %3184 = vmatmul.mubr.msk.bf16.gmra.mrb[8].mxu1 %vm226_vm3, %v3508_v15 }
  0x26   :  { %3077 = vmatprep.mubr.msk.bf16.mxu0 %vm3604_vm0, %v4956_v0  ;;  %3187 = vmatprep.mubr.msk.bf16.mxu1 %vm3604_vm0, %v4956_v0 }
  0x27   :  { %3284 = vmatpush3.bf16.msra.mxu0 %v307_v9  ;;  %3394 = vmatpush3.bf16.msra.mxu1 %v307_v9 }
  0x2d   :  { %3078 = vmatmul.mubr.msk.bf16.gmra.mrb[12].mxu0 %vm226_vm3, %v3509_v16  ;;  %3188 = vmatmul.mubr.msk.bf16.gmra.mrb[12].mxu1 %vm226_vm3, %v3510_v17 }
  0x2e   :  { %3081 = vmatprep.mubr.msk.bf16.mxu0 %vm3604_vm0, %v4956_v0  ;;  %3191 = vmatprep.mubr.msk.bf16.mxu1 %vm3604_vm0, %v4956_v0 }
  0x35   :  { %3082 = vmatmul.mubr.msk.bf16.gmra.mrb[16].mxu0 %vm226_vm3, %v3511_v18  ;;  %3192 = vmatmul.mubr.msk.bf16.gmra.mrb[16].mxu1 %vm226_vm3, %v3512_v19  ;;  %v3559_v18 = vld [vmem:[%s4953_s0 + $0x1a0] sm:$0xff]  }
  0x36   :  { %3085 = vmatprep.mubr.msk.bf16.mxu0 %vm3604_vm0, %v4956_v0  ;;  %3195 = vmatprep.mubr.msk.bf16.mxu1 %vm3604_vm0, %v4956_v0  ;;  %v3560_v19 = vld [vmem:[%s4953_s0 + $0x264] sm:$0xff]  }
  0x3d   :  { %3086 = vmatmul.mubr.msk.bf16.gmra.mrb[20].mxu0 %vm226_vm3, %v3513_v20  ;;  %3196 = vmatmul.mubr.msk.bf16.gmra.mrb[20].mxu1 %vm226_vm3, %v3514_v21 }
  0x3e   :  { %3089 = vmatprep.mubr.msk.bf16.mxu0 %vm3604_vm0, %v4956_v0  ;;  %3199 = vmatprep.mubr.msk.bf16.mxu1 %vm3604_vm0, %v4956_v0 }
  0x45   :  { %3090 = vmatmul.mubr.msk.bf16.gmra.mrb[24].mxu0 %vm226_vm3, %v3515_v22  ;;  %3200 = vmatmul.mubr.msk.bf16.gmra.mrb[24].mxu1 %vm226_vm3, %v3516_v23 }
  0x46   :  { %3093 = vmatprep.mubr.msk.bf16.mxu0 %vm3604_vm0, %v4956_v0  ;;  %3203 = vmatprep.mubr.msk.bf16.mxu1 %vm3604_vm0, %v4956_v0 }
  0x4d   :  { %3094 = vmatmul.mubr.msk.bf16.gmra.mrb[28].mxu0 %vm226_vm3, %v3517_v24  ;;  %3204 = vmatmul.mubr.msk.bf16.gmra.mrb[28].mxu1 %vm226_vm3, %v3518_v25 }
  0x4e   :  { %3097 = vmatprep.mubr.msk.bf16.mxu0 %vm3604_vm0, %v4956_v0  ;;  %3207 = vmatprep.mubr.msk.bf16.mxu1 %vm3604_vm0, %v4956_v0 }
  0x55   :  { %3098 = vmatmul.mubr.msk.bf16.gmra.mrb[32].mxu0 %vm226_vm3, %v3519_v26  ;;  %3208 = vmatmul.mubr.msk.bf16.gmra.mrb[32].mxu1 %vm226_vm3, %v3520_v27 }
  0x56   :  { %3101 = vmatprep.mubr.msk.bf16.mxu0 %vm3604_vm0, %v4956_v0  ;;  %3211 = vmatprep.mubr.msk.bf16.mxu1 %vm3604_vm0, %v4956_v0 }
  0x5d   :  { %3102 = vmatmul.mubr.msk.bf16.gmra.mrb[36].mxu0 %vm226_vm3, %v3521_v28  ;;  %3212 = vmatmul.mubr.msk.bf16.gmra.mrb[36].mxu1 %vm226_vm3, %v3522_v29 }
  0x5e   :  { %3105 = vmatprep.mubr.msk.bf16.mxu0 %vm3604_vm0, %v4956_v0  ;;  %3215 = vmatprep.mubr.msk.bf16.mxu1 %vm3604_vm0, %v4956_v0 }
  0x65   :  { %3106 = vmatmul.mubr.msk.bf16.gmra.mrb[40].mxu0 %vm226_vm3, %v3523_v30  ;;  %3216 = vmatmul.mubr.msk.bf16.gmra.mrb[40].mxu1 %vm226_vm3, %v3524_v31  ;;  %v3561_v30 = vld [vmem:[%s4953_s0 + $0x1a8] sm:$0xff]  }
  0x66   :  { %3109 = vmatprep.mubr.msk.bf16.mxu0 %vm3604_vm0, %v4956_v0  ;;  %3219 = vmatprep.mubr.msk.bf16.mxu1 %vm3604_vm0, %v4956_v0  ;;  %v3562_v31 = vld [vmem:[%s4953_s0 + $0x26c] sm:$0xff]  }
  0x6d   :  { %3110 = vmatmul.mubr.msk.bf16.gmra.mrb[44].mxu0 %vm226_vm3, %v3525_v32  ;;  %3220 = vmatmul.mubr.msk.bf16.gmra.mrb[44].mxu1 %vm226_vm3, %v3526_v33 }
  0x6e   :  { %3113 = vmatprep.mubr.msk.bf16.mxu0 %vm3604_vm0, %v4956_v0  ;;  %3223 = vmatprep.mubr.msk.bf16.mxu1 %vm3604_vm0, %v4956_v0 }
  0x75   :  { %3114 = vmatmul.mubr.msk.bf16.gmra.mrb[48].mxu0 %vm226_vm3, %v3527_v34  ;;  %3224 = vmatmul.mubr.msk.bf16.gmra.mrb[48].mxu1 %vm226_vm3, %v3528_v35 }
  0x76   :  { %3117 = vmatprep.mubr.msk.bf16.mxu0 %vm3604_vm0, %v4956_v0  ;;  %3227 = vmatprep.mubr.msk.bf16.mxu1 %vm3604_vm0, %v4956_v0 }
  0x7d   :  { %3118 = vmatmul.mubr.msk.bf16.gmra.mrb[52].mxu0 %vm226_vm3, %v3529_v36  ;;  %3228 = vmatmul.mubr.msk.bf16.gmra.mrb[52].mxu1 %vm226_vm3, %v3530_v37 }
  0x7e   :  { %3121 = vmatprep.mubr.msk.bf16.mxu0 %vm3604_vm0, %v4956_v0  ;;  %3231 = vmatprep.mubr.msk.bf16.mxu1 %vm3604_vm0, %v4956_v0 }
  0x85   :  { %3122 = vmatmul.mubr.msk.bf16.gmra.mrb[56].mxu0 %vm226_vm3, %v3531_v38  ;;  %3232 = vmatmul.mubr.msk.bf16.gmra.mrb[56].mxu1 %vm226_vm3, %v3532_v39 }
  0x86   :  { %3125 = vmatprep.mubr.msk.bf16.mxu0 %vm3604_vm0, %v4956_v0  ;;  %3235 = vmatprep.mubr.msk.bf16.mxu1 %vm3604_vm0, %v4956_v0 }
  0x8d   :  { %3126 = vmatmul.mubr.msk.bf16.gmra.mrb[60].mxu0 %vm226_vm3, %v3533_v40  ;;  %3236 = vmatmul.mubr.msk.bf16.gmra.mrb[60].mxu1 %vm226_vm3, %v3534_v41 }
  0x8e   :  { %3129 = vmatprep.mubr.msk.bf16.mxu0 %vm3604_vm0, %v4956_v0  ;;  %3239 = vmatprep.mubr.msk.bf16.mxu1 %vm3604_vm0, %v4956_v0 }
  0x95   :  { %3130 = vmatmul.mubr.msk.bf16.gmra.mrb[64].mxu0 %vm226_vm3, %v3535_v42  ;;  %3240 = vmatmul.mubr.msk.bf16.gmra.mrb[64].mxu1 %vm226_vm3, %v3536_v43  ;;  %v3563_v42 = vld [vmem:[%s4953_s0 + $0x1b0] sm:$0xff]  }
  0x96   :  { %3133 = vmatprep.mubr.msk.bf16.mxu0 %vm3604_vm0, %v4956_v0  ;;  %3243 = vmatprep.mubr.msk.bf16.mxu1 %vm3604_vm0, %v4956_v0  ;;  %v3564_v43 = vld [vmem:[%s4953_s0 + $0x274] sm:$0xff]  }
  0x9d   :  { %3134 = vmatmul.mubr.msk.bf16.gmra.mrb[68].mxu0 %vm226_vm3, %v3537_v44  ;;  %3244 = vmatmul.mubr.msk.bf16.gmra.mrb[68].mxu1 %vm226_vm3, %v3538_v45 }
  0x9e   :  { %3137 = vmatprep.mubr.msk.bf16.mxu0 %vm3604_vm0, %v4956_v0  ;;  %3247 = vmatprep.mubr.msk.bf16.mxu1 %vm3604_vm0, %v4956_v0 }
  0xa5   :  { %3138 = vmatmul.mubr.msk.bf16.gmra.mrb[72].mxu0 %vm226_vm3, %v3539_v46  ;;  %3248 = vmatmul.mubr.msk.bf16.gmra.mrb[72].mxu1 %vm226_vm3, %v3540_v47 }
  0xa6   :  { %3141 = vmatprep.mubr.msk.bf16.mxu0 %vm3604_vm0, %v4956_v0  ;;  %3251 = vmatprep.mubr.msk.bf16.mxu1 %vm3604_vm0, %v4956_v0 }
  0xad   :  { %3142 = vmatmul.mubr.msk.bf16.gmra.mrb[76].mxu0 %vm226_vm3, %v3541_v48  ;;  %3252 = vmatmul.mubr.msk.bf16.gmra.mrb[76].mxu1 %vm226_vm3, %v3542_v49 }
  0xae   :  { %3145 = vmatprep.mubr.msk.bf16.mxu0 %vm3604_vm0, %v4956_v0  ;;  %3255 = vmatprep.mubr.msk.bf16.mxu1 %vm3604_vm0, %v4956_v0 }
  0xb5   :  { %3146 = vmatmul.mubr.msk.bf16.gmra.mrb[80].mxu0 %vm226_vm3, %v3543_v50  ;;  %3256 = vmatmul.mubr.msk.bf16.gmra.mrb[80].mxu1 %vm226_vm3, %v3544_v51 }
  0xb6   :  { %3149 = vmatprep.mubr.msk.bf16.mxu0 %vm3604_vm0, %v4956_v0  ;;  %3259 = vmatprep.mubr.msk.bf16.mxu1 %vm3604_vm0, %v4956_v0 }
  0xbd   :  { %3150 = vmatmul.mubr.msk.bf16.gmra.mrb[84].mxu0 %vm226_vm3, %v3545_v52  ;;  %3260 = vmatmul.mubr.msk.bf16.gmra.mrb[84].mxu1 %vm226_vm3, %v3546_v53 }
  0xbe   :  { %3153 = vmatprep.mubr.msk.bf16.mxu0 %vm3604_vm0, %v4956_v0  ;;  %3263 = vmatprep.mubr.msk.bf16.mxu1 %vm3604_vm0, %v4956_v0 }
  0xc5   :  { %3154 = vmatmul.mubr.msk.bf16.gmra.mrb[88].mxu0 %vm226_vm3, %v3547_v54  ;;  %3264 = vmatmul.mubr.msk.bf16.gmra.mrb[88].mxu1 %vm226_vm3, %v3548_v55  ;;  %v3565_v54 = vld [vmem:[%s4953_s0 + $0x1b8] sm:$0xff]  }
  0xc6   :  { %3157 = vmatprep.mubr.msk.bf16.mxu0 %vm3604_vm0, %v4956_v0  ;;  %3267 = vmatprep.mubr.msk.bf16.mxu1 %vm3604_vm0, %v4956_v0  ;;  %v3566_v55 = vld [vmem:[%s4953_s0 + $0x27c] sm:$0xff]  }
  0xcd   :  { %3158 = vmatmul.mubr.msk.bf16.gmra.mrb[92].mxu0 %vm226_vm3, %v3549_v56  ;;  %3268 = vmatmul.mubr.msk.bf16.gmra.mrb[92].mxu1 %vm226_vm3, %v3550_v57 }
  0xce   :  { %3161 = vmatprep.mubr.msk.bf16.mxu0 %vm3604_vm0, %v4956_v0  ;;  %3271 = vmatprep.mubr.msk.bf16.mxu1 %vm3604_vm0, %v4956_v0 }
  0xd5   :  { %3162 = vmatmul.mubr.msk.bf16.gmra.mrb[96].mxu0 %vm226_vm3, %v3551_v58  ;;  %3272 = vmatmul.mubr.msk.bf16.gmra.mrb[96].mxu1 %vm226_vm3, %v3552_v59 }
  0xd6   :  { %3285 = vmatprep.mubr.msk.bf16.mxu0 %vm3604_vm0, %v4956_v0  ;;  %3395 = vmatprep.mubr.msk.bf16.mxu1 %vm3604_vm0, %v4956_v0 }
  0xdd   :  { %3286 = vmatmul.mubr.msk.bf16.vlgmr.msra.gmra.mrb[100].mxu0 %vm226_vm3, %v3553_v60  ;;  %3396 = vmatmul.mubr.msk.bf16.vlgmr.msra.gmra.mrb[100].mxu1 %vm226_vm3, %v3554_v61 }
  0xde   :  { %3289 = vmatprep.mubr.msk.bf16.mxu0 %vm3604_vm0, %v4956_v0  ;;  %3399 = vmatprep.mubr.msk.bf16.mxu1 %vm3604_vm0, %v4956_v0 }
  0xe5   :  { %3290 = vmatmul.mubr.msk.bf16.gmra.mrb[104].mxu0 %vm226_vm3, %v3555_v62  ;;  %3400 = vmatmul.mubr.msk.bf16.gmra.mrb[104].mxu1 %vm226_vm3, %v3556_v63 }
  0xe6   :  { %3293 = vmatprep.mubr.msk.bf16.mxu0 %vm3604_vm0, %v4956_v0  ;;  %3403 = vmatprep.mubr.msk.bf16.mxu1 %vm3604_vm0, %v4956_v0 }
  0xe8   :  { %v3989_v1 = vpop.f32.mrb[0].mxu0  ;;  %v3991_v2 = vpop.f32.mrb[0].mxu1 }
  0xe9   :  { %v3067_v4 = vpop.f32.mrb[1].mxu0  ;;  %v3177_v5 = vpop.f32.mrb[1].mxu1 }
  0xea   :  { %v4001_v8 = vpop.f32.mrb[2].mxu0  ;;  %v4003_v9 = vpop.f32.mrb[2].mxu1 }
  0xeb   :  { %v3068_v11 = vpop.f32.mrb[3].mxu0  ;;  %v3178_v12 = vpop.f32.mrb[3].mxu1 }
  0xed   :  { %3294 = vmatmul.mubr.msk.bf16.gmra.mrb[108].mxu0 %vm226_vm3, %v3557_v6  ;;  %3404 = vmatmul.mubr.msk.bf16.gmra.mrb[108].mxu1 %vm226_vm3, %v3558_v7  ;;  %v3567_v6 = vld [vmem:[%s4953_s0 + $0x1c0] sm:$0xff]  }
  0xee   :  { %3297 = vmatprep.mubr.msk.bf16.mxu0 %vm3604_vm0, %v4956_v0  ;;  %3407 = vmatprep.mubr.msk.bf16.mxu1 %vm3604_vm0, %v4956_v0  ;;  %v3568_v7 = vld [vmem:[%s4953_s0 + $0x284] sm:$0xff]  }
  0xf0   :  { %v4013_v13 = vpop.f32.mrb[4].mxu0  ;;  %v4015_v14 = vpop.f32.mrb[4].mxu1 }
  0xf1   :  { %v3071_v16 = vpop.f32.mrb[5].mxu0  ;;  %v3181_v17 = vpop.f32.mrb[5].mxu1 }
  0xf2   :  { %v4025_v20 = vpop.f32.mrb[6].mxu0  ;;  %v4027_v21 = vpop.f32.mrb[6].mxu1 }
  0xf3   :  { %v3072_v23 = vpop.f32.mrb[7].mxu0  ;;  %v3182_v24 = vpop.f32.mrb[7].mxu1 }
  0xf5   :  { %3298 = vmatmul.mubr.msk.bf16.gmra.mrb[112].mxu0 %vm226_vm3, %v3559_v18  ;;  %3408 = vmatmul.mubr.msk.bf16.gmra.mrb[112].mxu1 %vm226_vm3, %v3560_v19 }
  0xf6   :  { %3301 = vmatprep.mubr.msk.bf16.mxu0 %vm3604_vm0, %v4956_v0  ;;  %3411 = vmatprep.mubr.msk.bf16.mxu1 %vm3604_vm0, %v4956_v0 }
  0xf8   :  { %v4037_v25 = vpop.f32.mrb[8].mxu0  ;;  %v4039_v26 = vpop.f32.mrb[8].mxu1 }
  0xf9   :  { %v3075_v28 = vpop.f32.mrb[9].mxu0  ;;  %v3185_v29 = vpop.f32.mrb[9].mxu1 }
  0xfa   :  { %v4049_v32 = vpop.f32.mrb[10].mxu0  ;;  %v4051_v33 = vpop.f32.mrb[10].mxu1 }
  0xfb   :  { %v3076_v35 = vpop.f32.mrb[11].mxu0  ;;  %v3186_v36 = vpop.f32.mrb[11].mxu1 }
  0xfd   :  { %3302 = vmatmul.mubr.msk.bf16.gmra.mrb[116].mxu0 %vm226_vm3, %v3561_v30  ;;  %3412 = vmatmul.mubr.msk.bf16.gmra.mrb[116].mxu1 %vm226_vm3, %v3562_v31  ;;  %v3569_v30 = vld [vmem:[%s4953_s0 + $0x1c8] sm:$0xff]  }
  0xfe   :  { %3305 = vmatprep.mubr.msk.bf16.mxu0 %vm3604_vm0, %v4956_v0  ;;  %3415 = vmatprep.mubr.msk.bf16.mxu1 %vm3604_vm0, %v4956_v0  ;;  %v3570_v31 = vld [vmem:[%s4953_s0 + $0x28c] sm:$0xff]  }
 0x100   :  { %v4061_v37 = vpop.f32.mrb[12].mxu0  ;;  %v4063_v38 = vpop.f32.mrb[12].mxu1 }
 0x101   :  { %v3079_v40 = vpop.f32.mrb[13].mxu0  ;;  %v3189_v41 = vpop.f32.mrb[13].mxu1 }
 0x102   :  { %v4073_v44 = vpop.f32.mrb[14].mxu0  ;;  %v4075_v45 = vpop.f32.mrb[14].mxu1 }
 0x103   :  { %v3080_v47 = vpop.f32.mrb[15].mxu0  ;;  %v3190_v48 = vpop.f32.mrb[15].mxu1 }
 0x105   :  { %3306 = vmatmul.mubr.msk.bf16.gmra.mrb[120].mxu0 %vm226_vm3, %v3563_v42  ;;  %3416 = vmatmul.mubr.msk.bf16.gmra.mrb[120].mxu1 %vm226_vm3, %v3564_v43 }
 0x106   :  { %3309 = vmatprep.mubr.msk.bf16.mxu0 %vm3604_vm0, %v4956_v0  ;;  %3419 = vmatprep.mubr.msk.bf16.mxu1 %vm3604_vm0, %v4956_v0 }
 0x108   :  { %v4085_v49 = vpop.f32.mrb[16].mxu0  ;;  %v4087_v50 = vpop.f32.mrb[16].mxu1 }
 0x109   :  { %v3083_v52 = vpop.f32.mrb[17].mxu0  ;;  %v3193_v53 = vpop.f32.mrb[17].mxu1 }
 0x10a   :  { %v4097_v56 = vpop.f32.mrb[18].mxu0  ;;  %v4099_v57 = vpop.f32.mrb[18].mxu1 }
 0x10b   :  { %v3084_v59 = vpop.f32.mrb[19].mxu0  ;;  %v3194_v60 = vpop.f32.mrb[19].mxu1 }
 0x10d   :  { %3310 = vmatmul.mubr.msk.bf16.gmra.mrb[124].mxu0 %vm226_vm3, %v3565_v54  ;;  %3420 = vmatmul.mubr.msk.bf16.gmra.mrb[124].mxu1 %vm226_vm3, %v3566_v55  ;;  %v3571_v54 = vld [vmem:[%s4953_s0 + $0x1d0] sm:$0xff]  }
 0x10e   :  { %3313 = vmatprep.mubr.msk.bf16.mxu0 %vm3604_vm0, %v4956_v0  ;;  %3423 = vmatprep.mubr.msk.bf16.mxu1 %vm3604_vm0, %v4956_v0  ;;  %v3572_v55 = vld [vmem:[%s4953_s0 + $0x294] sm:$0xff]  }
 0x110   :  { %v4109_v61 = vpop.f32.mrb[20].mxu0  ;;  %v4111_v62 = vpop.f32.mrb[20].mxu1 }
 0x111   :  { %v3087_v4 = vpop.f32.mrb[21].mxu0  ;;  %v3197_v5 = vpop.f32.mrb[21].mxu1 }
 0x112   :  { %v4121_v11 = vpop.f32.mrb[22].mxu0  ;;  %v4123_v12 = vpop.f32.mrb[22].mxu1 }
 0x113   :  { %v3088_v17 = vpop.f32.mrb[23].mxu0  ;;  %v3198_v18 = vpop.f32.mrb[23].mxu1 }
 0x115   :  { %3314 = vmatmul.mubr.msk.bf16.gmra.mrb[128].mxu0 %vm226_vm3, %v3567_v6  ;;  %3424 = vmatmul.mubr.msk.bf16.gmra.mrb[128].mxu1 %vm226_vm3, %v3568_v7 }
 0x116   :  { %3317 = vmatprep.mubr.msk.bf16.mxu0 %vm3604_vm0, %v4956_v0  ;;  %3427 = vmatprep.mubr.msk.bf16.mxu1 %vm3604_vm0, %v4956_v0 }
 0x118   :  { %v4133_v19 = vpop.f32.mrb[24].mxu0  ;;  %v4135_v23 = vpop.f32.mrb[24].mxu1 }
 0x119   :  { %v3091_v28 = vpop.f32.mrb[25].mxu0  ;;  %v3201_v29 = vpop.f32.mrb[25].mxu1 }
 0x11a   :  { %v4145_v35 = vpop.f32.mrb[26].mxu0  ;;  %v4147_v36 = vpop.f32.mrb[26].mxu1 }
 0x11b   :  { %v3092_v41 = vpop.f32.mrb[27].mxu0  ;;  %v3202_v42 = vpop.f32.mrb[27].mxu1 }
 0x11d   :  { %3318 = vmatmul.mubr.msk.bf16.gmra.mrb[132].mxu0 %vm226_vm3, %v3569_v30  ;;  %3428 = vmatmul.mubr.msk.bf16.gmra.mrb[132].mxu1 %vm226_vm3, %v3570_v31  ;;  %v3573_v30 = vld [vmem:[%s4953_s0 + $0x1d8] sm:$0xff]  }
 0x11e   :  { %3321 = vmatprep.mubr.msk.bf16.mxu0 %vm3604_vm0, %v4956_v0  ;;  %3431 = vmatprep.mubr.msk.bf16.mxu1 %vm3604_vm0, %v4956_v0  ;;  %v3574_v31 = vld [vmem:[%s4953_s0 + $0x29c] sm:$0xff]  }
 0x120   :  { %v4157_v43 = vpop.f32.mrb[28].mxu0  ;;  %v4159_v47 = vpop.f32.mrb[28].mxu1 }
 0x121   :  { %v3095_v52 = vpop.f32.mrb[29].mxu0  ;;  %v3205_v53 = vpop.f32.mrb[29].mxu1 }
 0x122   :  { %v4169_v59 = vpop.f32.mrb[30].mxu0  ;;  %v4171_v60 = vpop.f32.mrb[30].mxu1 }
 0x123   :  { %v3096_v5 = vpop.f32.mrb[31].mxu0  ;;  %v3206_v6 = vpop.f32.mrb[31].mxu1 }
 0x125   :  { %3322 = vmatmul.mubr.msk.bf16.gmra.mrb[136].mxu0 %vm226_vm3, %v3571_v54  ;;  %3432 = vmatmul.mubr.msk.bf16.gmra.mrb[136].mxu1 %vm226_vm3, %v3572_v55 }
 0x126   :  { %3325 = vmatprep.mubr.msk.bf16.mxu0 %vm3604_vm0, %v4956_v0  ;;  %3435 = vmatprep.mubr.msk.bf16.mxu1 %vm3604_vm0, %v4956_v0 }
 0x128   :  { %v4181_v7 = vpop.f32.mrb[32].mxu0  ;;  %v4183_v17 = vpop.f32.mrb[32].mxu1 }
 0x129   :  { %v3099_v28 = vpop.f32.mrb[33].mxu0  ;;  %v3209_v29 = vpop.f32.mrb[33].mxu1 }
 0x12a   :  { %v4193_v41 = vpop.f32.mrb[34].mxu0  ;;  %v4195_v42 = vpop.f32.mrb[34].mxu1 }
 0x12b   :  { %v3100_v53 = vpop.f32.mrb[35].mxu0  ;;  %v3210_v54 = vpop.f32.mrb[35].mxu1 }
 0x12d   :  { %3326 = vmatmul.mubr.msk.bf16.gmra.mrb[140].mxu0 %vm226_vm3, %v3573_v30  ;;  %3436 = vmatmul.mubr.msk.bf16.gmra.mrb[140].mxu1 %vm226_vm3, %v3574_v31  ;;  %v3575_v30 = vld [vmem:[%s4953_s0 + $0x1e0] sm:$0xff]  }
 0x12e   :  { %3329 = vmatprep.mubr.msk.bf16.mxu0 %vm3604_vm0, %v4956_v0  ;;  %3439 = vmatprep.mubr.msk.bf16.mxu1 %vm3604_vm0, %v4956_v0  ;;  %v3576_v31 = vld [vmem:[%s4953_s0 + $0x2a4] sm:$0xff]  }
 0x130   :  { %v4205_v55 = vpop.f32.mrb[36].mxu0  ;;  %v4207_v5 = vpop.f32.mrb[36].mxu1 }
 0x131   :  { %v3103_v28 = vpop.f32.mrb[37].mxu0  ;;  %v3213_v29 = vpop.f32.mrb[37].mxu1 }
 0x132   :  { %v4217_v53 = vpop.f32.mrb[38].mxu0  ;;  %v4219_v54 = vpop.f32.mrb[38].mxu1 }
 0x133   :  { %v3104_v18 = vpop.f32.mrb[39].mxu0  ;;  %v3214_v4 = vpop.f32.mrb[39].mxu1 }
 0x134   :  { %v3577_v4 = vld [vmem:[%s4953_s0 + $0x1e8] sm:$0xff]  }
 0x135   :  { %3330 = vmatmul.mubr.msk.bf16.gmra.mrb[144].mxu0 %vm226_vm3, %v3575_v30  ;;  %3440 = vmatmul.mubr.msk.bf16.gmra.mrb[144].mxu1 %vm226_vm3, %v3576_v31  ;;  %v3578_v30 = vld [vmem:[%s4953_s0 + $0x2ac] sm:$0xff]  }
 0x136   :  { %3333 = vmatprep.mubr.msk.bf16.mxu0 %vm3604_vm0, %v4956_v0  ;;  %3443 = vmatprep.mubr.msk.bf16.mxu1 %vm3604_vm0, %v4956_v0 }
 0x138   :  { %v4229_v28 = vpop.f32.mrb[40].mxu0  ;;  %v4231_v29 = vpop.f32.mrb[40].mxu1 }
 0x139   :  { %v3107_v52 = vpop.f32.mrb[41].mxu0  ;;  %v3217_v18 = vpop.f32.mrb[41].mxu1 }
 0x13a   :  { %v4241_v31 = vpop.f32.mrb[42].mxu0  ;;  %v4243_v48 = vpop.f32.mrb[42].mxu1 }
 0x13b   :  { %v3108_v24 = vpop.f32.mrb[43].mxu0  ;;  %v3218_v16 = vpop.f32.mrb[43].mxu1 }
 0x13c   :  { %v3579_v16 = vld [vmem:[%s4953_s0 + $0x1f0] sm:$0xff]  }
 0x13d   :  { %3334 = vmatmul.mubr.msk.bf16.gmra.mrb[148].mxu0 %vm226_vm3, %v3577_v4  ;;  %3444 = vmatmul.mubr.msk.bf16.gmra.mrb[148].mxu1 %vm226_vm3, %v3578_v30  ;;  %v3580_v4 = vld [vmem:[%s4953_s0 + $0x2b4] sm:$0xff]  }
 0x13e   :  { %3337 = vmatprep.mubr.msk.bf16.mxu0 %vm3604_vm0, %v4956_v0  ;;  %3447 = vmatprep.mubr.msk.bf16.mxu1 %vm3604_vm0, %v4956_v0 }
 0x140   :  { %v4253_v52 = vpop.f32.mrb[44].mxu0  ;;  %v4255_v18 = vpop.f32.mrb[44].mxu1 }
 0x141   :  { %v3111_v40 = vpop.f32.mrb[45].mxu0  ;;  %v3221_v24 = vpop.f32.mrb[45].mxu1 }
 0x142   :  { %v4265_v30 = vpop.f32.mrb[46].mxu0  ;;  %v4267_v63 = vpop.f32.mrb[46].mxu1 }
 0x143   :  { %5009 = vst [vmem:[#allocation2_spill] sm:$0xff] %v4267_v63  ;;  %v3112_v51 = vpop.f32.mrb[47].mxu0  ;;  %v3222_v46 = vpop.f32.mrb[47].mxu1 }
 0x144   :  { %v3581_v46 = vld [vmem:[%s4953_s0 + $0x1f8] sm:$0xff]  }
 0x145   :  { %3338 = vmatmul.mubr.msk.bf16.gmra.mrb[152].mxu0 %vm226_vm3, %v3579_v16  ;;  %3448 = vmatmul.mubr.msk.bf16.gmra.mrb[152].mxu1 %vm226_vm3, %v3580_v4  ;;  %v3582_v16 = vld [vmem:[%s4953_s0 + $0x2bc] sm:$0xff]  }
 0x146   :  { %3341 = vmatprep.mubr.msk.bf16.mxu0 %vm3604_vm0, %v4956_v0  ;;  %3451 = vmatprep.mubr.msk.bf16.mxu1 %vm3604_vm0, %v4956_v0 }
 0x148   :  { %v4277_v40 = vpop.f32.mrb[48].mxu0  ;;  %v4279_v24 = vpop.f32.mrb[48].mxu1 }
 0x149   :  { %5010 = vst [vmem:[#allocation3_spill] sm:$0xff] %v4277_v40  ;;  %5011 = vst [vmem:[#allocation4_spill] sm:$0xff] %v4279_v24  ;;  %v3115_v58 = vpop.f32.mrb[49].mxu0  ;;  %v3225_v51 = vpop.f32.mrb[49].mxu1 }
 0x14a   :  { %v4289_v4 = vpop.f32.mrb[50].mxu0  ;;  %v4291_v39 = vpop.f32.mrb[50].mxu1 }
 0x14b   :  { %5012 = vst [vmem:[#allocation5_spill] sm:$0xff] %v4289_v4  ;;  %5013 = vst [vmem:[#allocation6_spill] sm:$0xff] %v4291_v39  ;;  %v3116_v27 = vpop.f32.mrb[51].mxu0  ;;  %v3226_v22 = vpop.f32.mrb[51].mxu1 }
 0x14c   :  { %v3583_v22 = vld [vmem:[%s4953_s0 + $0x200] sm:$0xff]  }
 0x14d   :  { %3342 = vmatmul.mubr.msk.bf16.gmra.mrb[156].mxu0 %vm226_vm3, %v3581_v46  ;;  %3452 = vmatmul.mubr.msk.bf16.gmra.mrb[156].mxu1 %vm226_vm3, %v3582_v16  ;;  %v3584_v46 = vld [vmem:[%s4953_s0 + $0x2c4] sm:$0xff]  }
 0x14e   :  { %3345 = vmatprep.mubr.msk.bf16.mxu0 %vm3604_vm0, %v4956_v0  ;;  %3455 = vmatprep.mubr.msk.bf16.mxu1 %vm3604_vm0, %v4956_v0 }
 0x150   :  { %v4301_v58 = vpop.f32.mrb[52].mxu0  ;;  %v4303_v51 = vpop.f32.mrb[52].mxu1 }
 0x151   :  { %5014 = vst [vmem:[#allocation7_spill] sm:$0xff] %v4301_v58  ;;  %5015 = vst [vmem:[#allocation8_spill] sm:$0xff] %v4303_v51  ;;  %v3119_v34 = vpop.f32.mrb[53].mxu0  ;;  %v3229_v27 = vpop.f32.mrb[53].mxu1 }
 0x152   :  { %v4313_v16 = vpop.f32.mrb[54].mxu0  ;;  %v4315_v15 = vpop.f32.mrb[54].mxu1  ;;  %v5018_v34 = vmov 0.0  }
 0x153   :  { %5016 = vst [vmem:[#allocation9_spill] sm:$0xff] %v4313_v16  ;;  %5017 = vst [vmem:[#allocation10_spill] sm:$0xff] %v4315_v15  ;;  %v3120_v3 = vpop.f32.mrb[55].mxu0  ;;  %v3230_v0 = vpop.f32.mrb[55].mxu1 }
 0x154   :  { %v3585_v0 = vld [vmem:[%s4953_s0 + $0x208] sm:$0xff]  }
 0x155   :  { %3346 = vmatmul.mubr.msk.bf16.gmra.mrb[160].mxu0 %vm226_vm3, %v3583_v22  ;;  %3456 = vmatmul.mubr.msk.bf16.gmra.mrb[160].mxu1 %vm226_vm3, %v3584_v46  ;;  %v3586_v22 = vld [vmem:[%s4953_s0 + $0x2cc] sm:$0xff]  }
 0x156   :  { %3349 = vmatprep.mubr.msk.bf16.mxu0 %vm3604_vm0, %v5018_v34  ;;  %3459 = vmatprep.mubr.msk.bf16.mxu1 %vm3604_vm0, %v5018_v34 }
 0x158   :  { %v4325_v27 = vpop.f32.mrb[56].mxu0  ;;  %v4327_v6 = vpop.f32.mrb[56].mxu1 }
 0x159   :  { %5019 = vst [vmem:[#allocation11_spill] sm:$0xff] %v4325_v27  ;;  %5020 = vst [vmem:[#allocation12_spill] sm:$0xff] %v4327_v6  ;;  %v3123_v10 = vpop.f32.mrb[57].mxu0  ;;  %v3233_v3 = vpop.f32.mrb[57].mxu1 }
 0x15a   :  { %v4337_v46 = vpop.f32.mrb[58].mxu0  ;;  %v4339_v15 = vpop.f32.mrb[58].mxu1 }
 0x15b   :  { %5021 = vst [vmem:[#allocation13_spill] sm:$0xff] %v4337_v46  ;;  %5022 = vst [vmem:[#allocation14_spill] sm:$0xff] %v4339_v15  ;;  %v3124_v58 = vpop.f32.mrb[59].mxu0  ;;  %v3234_v39 = vpop.f32.mrb[59].mxu1 }
 0x15c   :  { %v3587_v39 = vld [vmem:[%s4953_s0 + $0x210] sm:$0xff]  }
 0x15d   :  { %3350 = vmatmul.mubr.msk.bf16.gmra.mrb[164].mxu0 %vm226_vm3, %v3585_v0  ;;  %3460 = vmatmul.mubr.msk.bf16.gmra.mrb[164].mxu1 %vm226_vm3, %v3586_v22  ;;  %v3588_v0 = vld [vmem:[%s4953_s0 + $0x2d4] sm:$0xff]  }
 0x15e   :  { %3353 = vmatprep.mubr.msk.bf16.mxu0 %vm3604_vm0, %v5018_v34  ;;  %3463 = vmatprep.mubr.msk.bf16.mxu1 %vm3604_vm0, %v5018_v34 }
 0x160   :  { %v4349_v10 = vpop.f32.mrb[60].mxu0  ;;  %v4351_v3 = vpop.f32.mrb[60].mxu1 }
 0x161   :  { %5023 = vst [vmem:[#allocation15_spill] sm:$0xff] %v4349_v10  ;;  %5024 = vst [vmem:[#allocation16_spill] sm:$0xff] %v4351_v3  ;;  %v3127_v16 = vpop.f32.mrb[61].mxu0  ;;  %v3237_v58 = vpop.f32.mrb[61].mxu1 }
 0x162   :  { %v4361_v22 = vpop.f32.mrb[62].mxu0  ;;  %v4363_v15 = vpop.f32.mrb[62].mxu1 }
 0x163   :  { %5025 = vst [vmem:[#allocation17_spill] sm:$0xff] %v4361_v22  ;;  %5026 = vst [vmem:[#allocation18_spill] sm:$0xff] %v4363_v15  ;;  %v3128_v6 = vpop.f32.mrb[63].mxu0  ;;  %v3238_v27 = vpop.f32.mrb[63].mxu1 }
 0x164   :  { %v3589_v27 = vld [vmem:[%s4953_s0 + $0x218] sm:$0xff]  }
 0x165   :  { %3354 = vmatmul.mubr.msk.bf16.gmra.mrb[168].mxu0 %vm226_vm3, %v3587_v39  ;;  %3464 = vmatmul.mubr.msk.bf16.gmra.mrb[168].mxu1 %vm226_vm3, %v3588_v0  ;;  %v3590_v39 = vld [vmem:[%s4953_s0 + $0x2dc] sm:$0xff]  }
 0x166   :  { %3357 = vmatprep.mubr.msk.bf16.mxu0 %vm3604_vm0, %v5018_v34  ;;  %3467 = vmatprep.mubr.msk.bf16.mxu1 %vm3604_vm0, %v5018_v34 }
 0x168   :  { %v4373_v16 = vpop.f32.mrb[64].mxu0  ;;  %v4375_v58 = vpop.f32.mrb[64].mxu1 }
 0x169   :  { %5027 = vst [vmem:[#allocation19_spill] sm:$0xff] %v4373_v16  ;;  %5028 = vst [vmem:[#allocation20_spill] sm:$0xff] %v4375_v58  ;;  %v3131_v46 = vpop.f32.mrb[65].mxu0  ;;  %v3241_v6 = vpop.f32.mrb[65].mxu1 }
 0x16a   :  { %v4385_v0 = vpop.f32.mrb[66].mxu0  ;;  %v4387_v15 = vpop.f32.mrb[66].mxu1 }
 0x16b   :  { %5029 = vst [vmem:[#allocation21_spill] sm:$0xff] %v4385_v0  ;;  %5030 = vst [vmem:[#allocation22_spill] sm:$0xff] %v4387_v15  ;;  %v3132_v3 = vpop.f32.mrb[67].mxu0  ;;  %v3242_v10 = vpop.f32.mrb[67].mxu1 }
 0x16c   :  { %v3591_v10 = vld [vmem:[%s4953_s0 + $0x220] sm:$0xff]  }
 0x16d   :  { %3358 = vmatmul.mubr.msk.bf16.gmra.mrb[172].mxu0 %vm226_vm3, %v3589_v27  ;;  %3468 = vmatmul.mubr.msk.bf16.gmra.mrb[172].mxu1 %vm226_vm3, %v3590_v39  ;;  %v3592_v27 = vld [vmem:[%s4953_s0 + $0x2e4] sm:$0xff]  }
 0x16e   :  { %3361 = vmatprep.mubr.msk.bf16.mxu0 %vm3604_vm0, %v5018_v34  ;;  %3471 = vmatprep.mubr.msk.bf16.mxu1 %vm3604_vm0, %v5018_v34 }
 0x170   :  { %v4397_v46 = vpop.f32.mrb[68].mxu0  ;;  %v4399_v6 = vpop.f32.mrb[68].mxu1 }
 0x171   :  { %5031 = vst [vmem:[#allocation23_spill] sm:$0xff] %v4397_v46  ;;  %5032 = vst [vmem:[#allocation24_spill] sm:$0xff] %v4399_v6  ;;  %v3135_v22 = vpop.f32.mrb[69].mxu0  ;;  %v3245_v3 = vpop.f32.mrb[69].mxu1 }
 0x172   :  { %v4409_v39 = vpop.f32.mrb[70].mxu0  ;;  %v4411_v15 = vpop.f32.mrb[70].mxu1 }
 0x173   :  { %5033 = vst [vmem:[#allocation25_spill] sm:$0xff] %v4409_v39  ;;  %5034 = vst [vmem:[#allocation26_spill] sm:$0xff] %v4411_v15  ;;  %v3136_v58 = vpop.f32.mrb[71].mxu0  ;;  %v3246_v16 = vpop.f32.mrb[71].mxu1 }
 0x174   :  { %v3593_v16 = vld [vmem:[%s4953_s0 + $0x228] sm:$0xff]  }
 0x175   :  { %3362 = vmatmul.mubr.msk.bf16.gmra.mrb[176].mxu0 %vm226_vm3, %v3591_v10  ;;  %3472 = vmatmul.mubr.msk.bf16.gmra.mrb[176].mxu1 %vm226_vm3, %v3592_v27  ;;  %v3594_v10 = vld [vmem:[%s4953_s0 + $0x2ec] sm:$0xff]  }
 0x176   :  { %3365 = vmatprep.mubr.msk.bf16.mxu0 %vm3604_vm0, %v5018_v34  ;;  %3475 = vmatprep.mubr.msk.bf16.mxu1 %vm3604_vm0, %v5018_v34 }
 0x178   :  { %v4421_v22 = vpop.f32.mrb[72].mxu0  ;;  %v4423_v3 = vpop.f32.mrb[72].mxu1 }
 0x179   :  { %5035 = vst [vmem:[#allocation27_spill] sm:$0xff] %v4421_v22  ;;  %5036 = vst [vmem:[#allocation28_spill] sm:$0xff] %v4423_v3  ;;  %v3139_v0 = vpop.f32.mrb[73].mxu0  ;;  %v3249_v58 = vpop.f32.mrb[73].mxu1 }
 0x17a   :  { %v4433_v27 = vpop.f32.mrb[74].mxu0  ;;  %v4435_v15 = vpop.f32.mrb[74].mxu1 }
 0x17b   :  { %5037 = vst [vmem:[#allocation29_spill] sm:$0xff] %v4433_v27  ;;  %5038 = vst [vmem:[#allocation30_spill] sm:$0xff] %v4435_v15  ;;  %v3140_v6 = vpop.f32.mrb[75].mxu0  ;;  %v3250_v46 = vpop.f32.mrb[75].mxu1 }
 0x17c   :  { %v3595_v46 = vld [vmem:[%s4953_s0 + $0x230] sm:$0xff]  }
 0x17d   :  { %3366 = vmatmul.mubr.msk.bf16.gmra.mrb[180].mxu0 %vm226_vm3, %v3593_v16  ;;  %3476 = vmatmul.mubr.msk.bf16.gmra.mrb[180].mxu1 %vm226_vm3, %v3594_v10  ;;  %v3596_v16 = vld [vmem:[%s4953_s0 + $0x2f4] sm:$0xff]  }
 0x17e   :  { %3369 = vmatprep.mubr.msk.bf16.mxu0 %vm3604_vm0, %v5018_v34  ;;  %3479 = vmatprep.mubr.msk.bf16.mxu1 %vm3604_vm0, %v5018_v34 }
 0x180   :  { %v4445_v0 = vpop.f32.mrb[76].mxu0  ;;  %v4447_v58 = vpop.f32.mrb[76].mxu1 }
 0x181   :  { %5039 = vst [vmem:[#allocation31_spill] sm:$0xff] %v4445_v0  ;;  %5040 = vst [vmem:[#allocation32_spill] sm:$0xff] %v4447_v58  ;;  %v3143_v39 = vpop.f32.mrb[77].mxu0  ;;  %v3253_v6 = vpop.f32.mrb[77].mxu1 }
 0x182   :  { %v4457_v10 = vpop.f32.mrb[78].mxu0  ;;  %v4459_v15 = vpop.f32.mrb[78].mxu1 }
 0x183   :  { %5041 = vst [vmem:[#allocation33_spill] sm:$0xff] %v4457_v10  ;;  %5042 = vst [vmem:[#allocation34_spill] sm:$0xff] %v4459_v15  ;;  %v3144_v3 = vpop.f32.mrb[79].mxu0  ;;  %v3254_v22 = vpop.f32.mrb[79].mxu1 }
 0x184   :  { %v3597_v22 = vld [vmem:[%s4953_s0 + $0x238] sm:$0xff]  }
 0x185   :  { %3370 = vmatmul.mubr.msk.bf16.gmra.mrb[184].mxu0 %vm226_vm3, %v3595_v46  ;;  %3480 = vmatmul.mubr.msk.bf16.gmra.mrb[184].mxu1 %vm226_vm3, %v3596_v16  ;;  %v3598_v46 = vld [vmem:[%s4953_s0 + $0x2fc] sm:$0xff]  }
 0x186   :  { %3373 = vmatprep.mubr.msk.bf16.mxu0 %vm3604_vm0, %v5018_v34  ;;  %3483 = vmatprep.mubr.msk.bf16.mxu1 %vm3604_vm0, %v5018_v34 }
 0x188   :  { %v4469_v39 = vpop.f32.mrb[80].mxu0  ;;  %v4471_v6 = vpop.f32.mrb[80].mxu1 }
 0x189   :  { %5043 = vst [vmem:[#allocation35_spill] sm:$0xff] %v4469_v39  ;;  %5044 = vst [vmem:[#allocation36_spill] sm:$0xff] %v4471_v6  ;;  %v3147_v27 = vpop.f32.mrb[81].mxu0  ;;  %v3257_v3 = vpop.f32.mrb[81].mxu1 }
 0x18a   :  { %v4481_v16 = vpop.f32.mrb[82].mxu0  ;;  %v4483_v15 = vpop.f32.mrb[82].mxu1 }
 0x18b   :  { %5045 = vst [vmem:[#allocation37_spill] sm:$0xff] %v4481_v16  ;;  %5046 = vst [vmem:[#allocation38_spill] sm:$0xff] %v4483_v15  ;;  %v3148_v58 = vpop.f32.mrb[83].mxu0  ;;  %v3258_v0 = vpop.f32.mrb[83].mxu1 }
 0x18c   :  { %v3599_v0 = vld [vmem:[%s4953_s0 + $0x240] sm:$0xff]  }
 0x18d   :  { %3374 = vmatmul.mubr.msk.bf16.gmra.mrb[188].mxu0 %vm226_vm3, %v3597_v22  ;;  %3484 = vmatmul.mubr.msk.bf16.gmra.mrb[188].mxu1 %vm226_vm3, %v3598_v46  ;;  %v3600_v22 = vld [vmem:[%s4953_s0 + $0x304] sm:$0xff]  }
 0x18e   :  { %3377 = vmatprep.mubr.msk.bf16.mxu0 %vm3604_vm0, %v5018_v34  ;;  %3487 = vmatprep.mubr.msk.bf16.mxu1 %vm3604_vm0, %v5018_v34 }
 0x190   :  { %v4493_v27 = vpop.f32.mrb[84].mxu0  ;;  %v4495_v3 = vpop.f32.mrb[84].mxu1 }
 0x191   :  { %5047 = vst [vmem:[#allocation39_spill] sm:$0xff] %v4493_v27  ;;  %5048 = vst [vmem:[#allocation40_spill] sm:$0xff] %v4495_v3  ;;  %v3151_v10 = vpop.f32.mrb[85].mxu0  ;;  %v3261_v58 = vpop.f32.mrb[85].mxu1 }
 0x192   :  { %v4505_v46 = vpop.f32.mrb[86].mxu0  ;;  %v4507_v15 = vpop.f32.mrb[86].mxu1 }
 0x193   :  { %5049 = vst [vmem:[#allocation41_spill] sm:$0xff] %v4505_v46  ;;  %5050 = vst [vmem:[#allocation42_spill] sm:$0xff] %v4507_v15  ;;  %v3152_v6 = vpop.f32.mrb[87].mxu0  ;;  %v3262_v39 = vpop.f32.mrb[87].mxu1 }
 0x194   :  { %v3601_v39 = vld [vmem:[%s4953_s0 + $0x248] ss:$0 sps:$4 sm:$0xff]  }
 0x195   :  { %3378 = vmatmul.mubr.msk.bf16.gmra.mrb[192].mxu0 %vm226_vm3, %v3599_v0  ;;  %3488 = vmatmul.mubr.msk.bf16.gmra.mrb[192].mxu1 %vm226_vm3, %v3600_v22  ;;  %v3602_v0 = vld [vmem:[%s4953_s0 + $0x30c] ss:$0 sps:$4 sm:$0xff]  }
 0x196   :  { %3381 = vmatprep.mubr.msk.bf16.mxu0 %vm3604_vm0, %v5018_v34  ;;  %3491 = vmatprep.mubr.msk.bf16.mxu1 %vm3604_vm0, %v5018_v34 }
 0x198   :  { %v4517_v10 = vpop.f32.mrb[88].mxu0  ;;  %v4519_v58 = vpop.f32.mrb[88].mxu1 }
 0x199   :  { %5051 = vst [vmem:[#allocation43_spill] sm:$0xff] %v4517_v10  ;;  %5052 = vst [vmem:[#allocation44_spill] sm:$0xff] %v4519_v58  ;;  %v3155_v16 = vpop.f32.mrb[89].mxu0  ;;  %v3265_v6 = vpop.f32.mrb[89].mxu1 }
 0x19a   :  { %v4529_v22 = vpop.f32.mrb[90].mxu0  ;;  %v4531_v34 = vpop.f32.mrb[90].mxu1 }
 0x19b   :  { %5053 = vst [vmem:[#allocation45_spill] sm:$0xff] %v4529_v22  ;;  %5054 = vst [vmem:[#allocation46_spill] sm:$0xff] %v4531_v34  ;;  %v3156_v46 = vpop.f32.mrb[91].mxu0  ;;  %v3266_v3 = vpop.f32.mrb[91].mxu1 }
 0x19c   :  { %v5061_v3 = vmax.f32 %v3989_v1, %v3991_v2 }
 0x19d   :  { %3382 = vmatmul.mubr.msk.bf16.gmra.mrb[196].mxu0 %vm226_vm3, %v3601_v39  ;;  %3492 = vmatmul.mubr.msk.bf16.gmra.mrb[196].mxu1 %vm226_vm3, %v3602_v0 }
 0x1a0   :  { %v4537_v16 = vpop.f32.mrb[92].mxu0  ;;  %v4539_v6 = vpop.f32.mrb[92].mxu1 }
 0x1a1   :  { %5055 = vst [vmem:[#allocation47_spill] sm:$0xff] %v4537_v16  ;;  %5056 = vst [vmem:[#allocation48_spill] sm:$0xff] %v4539_v6  ;;  %v3159_v58 = vpop.f32.mrb[93].mxu0  ;;  %v3269_v10 = vpop.f32.mrb[93].mxu1 }
 0x1a2   :  { %v4543_v27 = vpop.f32.mrb[94].mxu0  ;;  %v4545_v4 = vpop.f32.mrb[94].mxu1 }
 0x1a3   :  { %5057 = vst [vmem:[#allocation49_spill] sm:$0xff] %v4543_v27  ;;  %5058 = vst [vmem:[#allocation50_spill] sm:$0xff] %v4545_v4  ;;  %v3160_v46 = vpop.f32.mrb[95].mxu0  ;;  %v3270_v39 = vpop.f32.mrb[95].mxu1  ;;  %v4561_v27 = vld [vmem:[%s4954_s2] ss:$0 sm:$0xff] }
 0x1a8   :  { %v4549_v15 = vpop.f32.mrb[96].mxu0  ;;  %v4551_v0 = vpop.f32.mrb[96].mxu1 }
 0x1a9   :  { %5059 = vst [vmem:[#allocation51_spill] sm:$0xff] %v4549_v15  ;;  %5060 = vst [vmem:[#allocation52_spill] sm:$0xff] %v4551_v0  ;;  %v3163_v22 = vpop.f32.mrb[97].mxu0  ;;  %v3273_v51 = vpop.f32.mrb[97].mxu1 }
 0x1aa   :  { %v538_v58 = vpop.f32.mrb[98].mxu0  ;;  %v1018_v10 = vpop.f32.mrb[98].mxu1 }
 0x1ab   :  { %v3164_v6 = vpop.f32.mrb[99].mxu0  ;;  %v3274_v16 = vpop.f32.mrb[99].mxu1 }
 0x1ac   :  { %v5062_v6 = vmax.f32 %v4001_v8, %v4003_v9 }
 0x1b0   :  { %v1352_v24 = vpop.f32.mrb[100].mxu0  ;;  %v1881_v40 = vpop.f32.mrb[100].mxu1 }
 0x1b1   :  { %v1550_v46 = vmax.f32 %v5061_v3, %v1352_v24  ;;  %v3287_v39 = vpop.f32.mrb[101].mxu0  ;;  %v3397_v4 = vpop.f32.mrb[101].mxu1 }
 0x1b2   :  { %v1355_v34 = vpop.f32.mrb[102].mxu0  ;;  %v1884_v22 = vpop.f32.mrb[102].mxu1 }
 0x1b3   :  { %v2079_v51 = vmax.f32 %v1550_v46, %v1881_v40  ;;  %v1551_v16 = vmax.f32 %v5062_v6, %v1355_v34  ;;  %v3288_v58 = vpop.f32.mrb[103].mxu0  ;;  %v3398_v10 = vpop.f32.mrb[103].mxu1  ;;  %v5063_v40 = vmax.f32 %v4013_v13, %v4015_v14 }
 0x1b5   :  { %v2135_v0 = vadd.f32 %v4561_v27, %v2079_v51  ;;  %v2080_v1 = vmax.f32 %v1551_v16, %v1884_v22  ;;  %v5064_v51 = vmax.f32 %v4025_v20, %v4027_v21  ;;  %v5065_v20 = vmax.f32 %v4037_v25, %v4039_v26 }
 0x1b7   :  { %v2184_v2 = vmax.f32 %v2135_v0, 0.0  ;;  %v2136_v24 = vadd.f32 %v4561_v27, %v2080_v1 }
 0x1b8   :  { %v1360_v4 = vpop.f32.mrb[104].mxu0  ;;  %v1889_v3 = vpop.f32.mrb[104].mxu1 }
 0x1b9   :  { %v2886_v39 = vpack.c.bf16 %v2184_v2, %v2184_v2  ;;  %v2185_v15 = vmax.f32 %v2136_v24, 0.0  ;;  %v1552_v46 = vmax.f32 %v5063_v40, %v1360_v4  ;;  %v3291_v63 = vpop.f32.mrb[105].mxu0  ;;  %v3401_v8 = vpop.f32.mrb[105].mxu1 }
 0x1ba   :  { %v1363_v9 = vpop.f32.mrb[106].mxu0  ;;  %v1892_v34 = vpop.f32.mrb[106].mxu1 }
 0x1bb   :  { %2431 = vst.msk [vmem:[%s4955_s3] sm:$0xf] %vm2430_vm4, %v2886_v39  ;;  %v2887_v0 = vpack.c.bf16 %v2185_v15, %v2185_v15  ;;  %v2081_v22 = vmax.f32 %v1552_v46, %v1889_v3  ;;  %v1553_v6 = vmax.f32 %v5064_v51, %v1363_v9  ;;  %v3292_v16 = vpop.f32.mrb[107].mxu0  ;;  %v3402_v58 = vpop.f32.mrb[107].mxu1  ;;  %v5066_v9 = vmax.f32 %v4049_v32, %v4051_v33 }
 0x1bc   :  { %v5067_v32 = vmax.f32 %v4061_v37, %v4063_v38 }
 0x1bd   :  { %2432 = vst.msk [vmem:[%s4955_s3 + $0x4] sm:$0xf] %vm2430_vm4, %v2887_v0  ;;  %v2137_v13 = vadd.f32 %v4561_v27, %v2081_v22  ;;  %v2082_v14 = vmax.f32 %v1553_v6, %v1892_v34 }
 0x1bf   :  { %v2186_v63 = vmax.f32 %v2137_v13, 0.0  ;;  %v2138_v10 = vadd.f32 %v4561_v27, %v2082_v14 }
 0x1c0   :  { %v1368_v1 = vpop.f32.mrb[108].mxu0  ;;  %v1897_v15 = vpop.f32.mrb[108].mxu1 }
 0x1c1   :  { %v2888_v2 = vpack.c.bf16 %v2186_v63, %v2186_v63  ;;  %v2187_v24 = vmax.f32 %v2138_v10, 0.0  ;;  %v1554_v21 = vmax.f32 %v5065_v20, %v1368_v1  ;;  %v3295_v4 = vpop.f32.mrb[109].mxu0  ;;  %v3405_v3 = vpop.f32.mrb[109].mxu1  ;;  %v5068_v20 = vmax.f32 %v4073_v44, %v4075_v45 }
 0x1c2   :  { %v1371_v39 = vpop.f32.mrb[110].mxu0  ;;  %v1900_v40 = vpop.f32.mrb[110].mxu1  ;;  %v5069_v44 = vmax.f32 %v4085_v49, %v4087_v50 }
 0x1c3   :  { %2433 = vst.msk [vmem:[%s4955_s3 + $0x8] sm:$0xf] %vm2430_vm4, %v2888_v2  ;;  %v2889_v46 = vpack.c.bf16 %v2187_v24, %v2187_v24  ;;  %v2083_v8 = vmax.f32 %v1554_v21, %v1897_v15  ;;  %v1555_v34 = vmax.f32 %v5066_v9, %v1371_v39  ;;  %v3296_v0 = vpop.f32.mrb[111].mxu0  ;;  %v3406_v22 = vpop.f32.mrb[111].mxu1 }
 0x1c5   :  { %2434 = vst.msk [vmem:[%s4955_s3 + $0xc] sm:$0xf] %vm2430_vm4, %v2889_v46  ;;  %v2139_v25 = vadd.f32 %v4561_v27, %v2083_v8  ;;  %v2084_v26 = vmax.f32 %v1555_v34, %v1900_v40 }
 0x1c7   :  { %v2188_v51 = vmax.f32 %v2139_v25, 0.0  ;;  %v2140_v6 = vadd.f32 %v4561_v27, %v2084_v26 }
 0x1c8   :  { %v1376_v16 = vpop.f32.mrb[112].mxu0  ;;  %v1905_v58 = vpop.f32.mrb[112].mxu1 }
 0x1c9   :  { %v2890_v13 = vpack.c.bf16 %v2188_v51, %v2188_v51  ;;  %v2189_v14 = vmax.f32 %v2140_v6, 0.0  ;;  %v1556_v33 = vmax.f32 %v5067_v32, %v1376_v16  ;;  %v3299_v63 = vpop.f32.mrb[113].mxu0  ;;  %v3409_v10 = vpop.f32.mrb[113].mxu1  ;;  %v5070_v16 = vmax.f32 %v4097_v56, %v4099_v57 }
 0x1ca   :  { %v1379_v1 = vpop.f32.mrb[114].mxu0  ;;  %v1908_v15 = vpop.f32.mrb[114].mxu1  ;;  %v5071_v56 = vmax.f32 %v4109_v61, %v4111_v62 }
 0x1cb   :  { %2435 = vst.msk [vmem:[%s4955_s3 + $0x10] sm:$0xf] %vm2430_vm4, %v2890_v13  ;;  %v2891_v2 = vpack.c.bf16 %v2189_v14, %v2189_v14  ;;  %v2085_v24 = vmax.f32 %v1556_v33, %v1905_v58  ;;  %v1557_v21 = vmax.f32 %v5068_v20, %v1379_v1  ;;  %v3300_v4 = vpop.f32.mrb[115].mxu0  ;;  %v3410_v3 = vpop.f32.mrb[115].mxu1 }
 0x1cd   :  { %2436 = vst.msk [vmem:[%s4955_s3 + $0x14] sm:$0xf] %vm2430_vm4, %v2891_v2  ;;  %v2141_v37 = vadd.f32 %v4561_v27, %v2085_v24  ;;  %v2086_v38 = vmax.f32 %v1557_v21, %v1908_v15 }
 0x1cf   :  { %v2190_v39 = vmax.f32 %v2141_v37, 0.0  ;;  %v2142_v40 = vadd.f32 %v4561_v27, %v2086_v38  ;;  %v5072_v37 = vmax.f32 %v4121_v11, %v4123_v12  ;;  %v5073_v11 = vmax.f32 %v4133_v19, %v4135_v23 }
 0x1d0   :  { %v1384_v46 = vpop.f32.mrb[116].mxu0  ;;  %v1913_v8 = vpop.f32.mrb[116].mxu1 }
 0x1d1   :  { %v2892_v9 = vpack.c.bf16 %v2190_v39, %v2190_v39  ;;  %v2191_v34 = vmax.f32 %v2142_v40, 0.0  ;;  %v1558_v45 = vmax.f32 %v5069_v44, %v1384_v46  ;;  %v3303_v0 = vpop.f32.mrb[117].mxu0  ;;  %v3413_v22 = vpop.f32.mrb[117].mxu1 }
 0x1d2   :  { %v1387_v25 = vpop.f32.mrb[118].mxu0  ;;  %v1916_v26 = vpop.f32.mrb[118].mxu1 }
 0x1d3   :  { %2437 = vst.msk [vmem:[%s4955_s3 + $0x18] sm:$0xf] %vm2430_vm4, %v2892_v9  ;;  %v2893_v51 = vpack.c.bf16 %v2191_v34, %v2191_v34  ;;  %v2087_v6 = vmax.f32 %v1558_v45, %v1913_v8  ;;  %v1559_v58 = vmax.f32 %v5070_v16, %v1387_v25  ;;  %v3304_v13 = vpop.f32.mrb[119].mxu0  ;;  %v3414_v14 = vpop.f32.mrb[119].mxu1  ;;  %v5074_v16 = vmax.f32 %v4145_v35, %v4147_v36 }
 0x1d4   :  { %v5075_v35 = vmax.f32 %v4157_v43, %v4159_v47 }
 0x1d5   :  { %2438 = vst.msk [vmem:[%s4955_s3 + $0x1c] sm:$0xf] %vm2430_vm4, %v2893_v51  ;;  %v2143_v49 = vadd.f32 %v4561_v27, %v2087_v6  ;;  %v2088_v50 = vmax.f32 %v1559_v58, %v1916_v26 }
 0x1d7   :  { %v2192_v32 = vmax.f32 %v2143_v49, 0.0  ;;  %v2144_v33 = vadd.f32 %v4561_v27, %v2088_v50 }
 0x1d8   :  { %v1392_v63 = vpop.f32.mrb[120].mxu0  ;;  %v1921_v10 = vpop.f32.mrb[120].mxu1 }
 0x1d9   :  { %v2894_v1 = vpack.c.bf16 %v2192_v32, %v2192_v32  ;;  %v2193_v15 = vmax.f32 %v2144_v33, 0.0  ;;  %v1560_v57 = vmax.f32 %v5071_v56, %v1392_v63  ;;  %v3307_v2 = vpop.f32.mrb[121].mxu0  ;;  %v3417_v24 = vpop.f32.mrb[121].mxu1 }
 0x1da   :  { %v1395_v20 = vpop.f32.mrb[122].mxu0  ;;  %v1924_v21 = vpop.f32.mrb[122].mxu1 }
 0x1db   :  { %2439 = vst.msk [vmem:[%s4955_s3 + $0x20] sm:$0xf] %vm2430_vm4, %v2894_v1  ;;  %v2895_v4 = vpack.c.bf16 %v2193_v15, %v2193_v15  ;;  %v2089_v3 = vmax.f32 %v1560_v57, %v1921_v10  ;;  %v1561_v38 = vmax.f32 %v5072_v37, %v1395_v20  ;;  %v3308_v39 = vpop.f32.mrb[123].mxu0  ;;  %v3418_v40 = vpop.f32.mrb[123].mxu1  ;;  %v5076_v20 = vmax.f32 %v4169_v59, %v4171_v60 }
 0x1dc   :  { %v5077_v59 = vmax.f32 %v4181_v7, %v4183_v17 }
 0x1dd   :  { %2440 = vst.msk [vmem:[%s4955_s3 + $0x24] sm:$0xf] %vm2430_vm4, %v2895_v4  ;;  %v2145_v61 = vadd.f32 %v4561_v27, %v2089_v3  ;;  %v2090_v62 = vmax.f32 %v1561_v38, %v1924_v21 }
 0x1df   :  { %v2194_v46 = vmax.f32 %v2145_v61, 0.0  ;;  %v2146_v8 = vadd.f32 %v4561_v27, %v2090_v62 }
 0x1e0   :  { %v1400_v9 = vpop.f32.mrb[124].mxu0  ;;  %v1929_v34 = vpop.f32.mrb[124].mxu1 }
 0x1e1   :  { %v2896_v44 = vpack.c.bf16 %v2194_v46, %v2194_v46  ;;  %v2195_v45 = vmax.f32 %v2146_v8, 0.0  ;;  %v1562_v12 = vmax.f32 %v5073_v11, %v1400_v9  ;;  %v3311_v0 = vpop.f32.mrb[125].mxu0  ;;  %v3421_v22 = vpop.f32.mrb[125].mxu1  ;;  %v5078_v11 = vmax.f32 %v4193_v41, %v4195_v42 }
 0x1e2   :  { %v1403_v25 = vpop.f32.mrb[126].mxu0  ;;  %v1932_v26 = vpop.f32.mrb[126].mxu1  ;;  %v5079_v41 = vmax.f32 %v4205_v55, %v4207_v5 }
 0x1e3   :  { %2441 = vst.msk [vmem:[%s4955_s3 + $0x28] sm:$0xf] %vm2430_vm4, %v2896_v44  ;;  %v2897_v51 = vpack.c.bf16 %v2195_v45, %v2195_v45  ;;  %v2091_v6 = vmax.f32 %v1562_v12, %v1929_v34  ;;  %v1563_v58 = vmax.f32 %v5074_v16, %v1403_v25  ;;  %v3312_v13 = vpop.f32.mrb[127].mxu0  ;;  %v3422_v14 = vpop.f32.mrb[127].mxu1 }
 0x1e5   :  { %2442 = vst.msk [vmem:[%s4955_s3 + $0x2c] sm:$0xf] %vm2430_vm4, %v2897_v51  ;;  %v2147_v19 = vadd.f32 %v4561_v27, %v2091_v6  ;;  %v2092_v23 = vmax.f32 %v1563_v58, %v1932_v26 }
 0x1e7   :  { %v2196_v49 = vmax.f32 %v2147_v19, 0.0  ;;  %v2148_v50 = vadd.f32 %v4561_v27, %v2092_v23 }
 0x1e8   :  { %v1408_v32 = vpop.f32.mrb[128].mxu0  ;;  %v1937_v33 = vpop.f32.mrb[128].mxu1 }
 0x1e9   :  { %v2898_v63 = vpack.c.bf16 %v2196_v49, %v2196_v49  ;;  %v2197_v10 = vmax.f32 %v2148_v50, 0.0  ;;  %v1564_v36 = vmax.f32 %v5075_v35, %v1408_v32  ;;  %v3315_v1 = vpop.f32.mrb[129].mxu0  ;;  %v3425_v15 = vpop.f32.mrb[129].mxu1  ;;  %v5080_v32 = vmax.f32 %v4217_v53, %v4219_v54 }
 0x1ea   :  { %v1411_v56 = vpop.f32.mrb[130].mxu0  ;;  %v1940_v57 = vpop.f32.mrb[130].mxu1  ;;  %v5081_v53 = vmax.f32 %v4229_v28, %v4231_v29 }
 0x1eb   :  { %2443 = vst.msk [vmem:[%s4955_s3 + $0x30] sm:$0xf] %vm2430_vm4, %v2898_v63  ;;  %v2899_v2 = vpack.c.bf16 %v2197_v10, %v2197_v10  ;;  %v2093_v24 = vmax.f32 %v1564_v36, %v1937_v33  ;;  %v1565_v21 = vmax.f32 %v5076_v20, %v1411_v56  ;;  %v3316_v4 = vpop.f32.mrb[131].mxu0  ;;  %v3426_v3 = vpop.f32.mrb[131].mxu1 }
 0x1ed   :  { %2444 = vst.msk [vmem:[%s4955_s3 + $0x34] sm:$0xf] %vm2430_vm4, %v2899_v2  ;;  %v2149_v43 = vadd.f32 %v4561_v27, %v2093_v24  ;;  %v2094_v47 = vmax.f32 %v1565_v21, %v1940_v57 }
 0x1ef   :  { %v2198_v37 = vmax.f32 %v2149_v43, 0.0  ;;  %v2150_v38 = vadd.f32 %v4561_v27, %v2094_v47  ;;  %v5082_v43 = vmax.f32 %v4241_v31, %v4243_v48  ;;  %v5083_v48 = vmax.f32 %v4253_v52, %v4255_v18 }
 0x1f0   :  { %v1416_v39 = vpop.f32.mrb[132].mxu0  ;;  %v1945_v40 = vpop.f32.mrb[132].mxu1 }
 0x1f1   :  { %v2900_v61 = vpack.c.bf16 %v2198_v37, %v2198_v37  ;;  %v2199_v62 = vmax.f32 %v2150_v38, 0.0  ;;  %v1566_v60 = vmax.f32 %v5077_v59, %v1416_v39  ;;  %v3319_v46 = vpop.f32.mrb[133].mxu0  ;;  %v3429_v8 = vpop.f32.mrb[133].mxu1 }
 0x1f2   :  { %v1419_v9 = vpop.f32.mrb[134].mxu0  ;;  %v1948_v34 = vpop.f32.mrb[134].mxu1 }
 0x1f3   :  { %2445 = vst.msk [vmem:[%s4955_s3 + $0x38] sm:$0xf] %vm2430_vm4, %v2900_v61  ;;  %v2901_v44 = vpack.c.bf16 %v2199_v62, %v2199_v62  ;;  %v2095_v45 = vmax.f32 %v1566_v60, %v1945_v40  ;;  %v1567_v12 = vmax.f32 %v5078_v11, %v1419_v9  ;;  %v3320_v0 = vpop.f32.mrb[135].mxu0  ;;  %v3430_v22 = vpop.f32.mrb[135].mxu1  ;;  %v5084_v11 = vld [vmem:[#allocation2_spill] sm:$0xff] }
 0x1f5   :  { %2446 = vst.msk [vmem:[%s4955_s3 + $0x3c] sm:$0xf] %vm2430_vm4, %v2901_v44  ;;  %v2151_v7 = vadd.f32 %v4561_v27, %v2095_v45  ;;  %v2096_v17 = vmax.f32 %v1567_v12, %v1948_v34  ;;  %v5085_v12 = vmax.f32 %v4265_v30, %v5084_v11  ;;  %v5087_v30 = vld [vmem:[#allocation4_spill] sm:$0xff] }
 0x1f7   :  { %v2200_v25 = vmax.f32 %v2151_v7, 0.0  ;;  %v2152_v26 = vadd.f32 %v4561_v27, %v2096_v17 }
 0x1f8   :  { %v1424_v51 = vpop.f32.mrb[136].mxu0  ;;  %v1953_v6 = vpop.f32.mrb[136].mxu1 }
 0x1f9   :  { %v2902_v16 = vpack.c.bf16 %v2200_v25, %v2200_v25  ;;  %v2201_v58 = vmax.f32 %v2152_v26, 0.0  ;;  %v1568_v42 = vmax.f32 %v5079_v41, %v1424_v51  ;;  %v3323_v13 = vpop.f32.mrb[137].mxu0  ;;  %v3433_v14 = vpop.f32.mrb[137].mxu1 }
 0x1fa   :  { %v1427_v19 = vpop.f32.mrb[138].mxu0  ;;  %v1956_v23 = vpop.f32.mrb[138].mxu1 }
 0x1fb   :  { %2447 = vst.msk [vmem:[%s4955_s3 + $0x40] sm:$0xf] %vm2430_vm4, %v2902_v16  ;;  %v2903_v49 = vpack.c.bf16 %v2201_v58, %v2201_v58  ;;  %v2097_v50 = vmax.f32 %v1568_v42, %v1953_v6  ;;  %v1569_v33 = vmax.f32 %v5080_v32, %v1427_v19  ;;  %v3324_v63 = vpop.f32.mrb[139].mxu0  ;;  %v3434_v10 = vpop.f32.mrb[139].mxu1  ;;  %v5086_v58 = vld [vmem:[#allocation3_spill] sm:$0xff]  ;;  %v5089_v32 = vld [vmem:[#allocation5_spill] sm:$0xff] }
 0x1fc   :  { %v5088_v41 = vmax.f32 %v5086_v58, %v5087_v30 }
 0x1fd   :  { %2448 = vst.msk [vmem:[%s4955_s3 + $0x44] sm:$0xf] %vm2430_vm4, %v2903_v49  ;;  %v2153_v55 = vadd.f32 %v4561_v27, %v2097_v50  ;;  %v2098_v5 = vmax.f32 %v1569_v33, %v1956_v23  ;;  %v5090_v33 = vld [vmem:[#allocation6_spill] sm:$0xff] }
 0x1fe   :  { %v5091_v63 = vmax.f32 %v5089_v32, %v5090_v33  ;;  %v5105_v32 = vld [vmem:[#allocation16_spill] sm:$0xff] }
 0x1ff   :  { %v2202_v35 = vmax.f32 %v2153_v55, 0.0  ;;  %v2154_v36 = vadd.f32 %v4561_v27, %v2098_v5 }
 0x200   :  { %v1432_v1 = vpop.f32.mrb[140].mxu0  ;;  %v1961_v15 = vpop.f32.mrb[140].mxu1 }
 0x201   :  { %v2904_v56 = vpack.c.bf16 %v2202_v35, %v2202_v35  ;;  %v2203_v57 = vmax.f32 %v2154_v36, 0.0  ;;  %v1570_v54 = vmax.f32 %v5081_v53, %v1432_v1  ;;  %v3327_v2 = vpop.f32.mrb[141].mxu0  ;;  %v3437_v24 = vpop.f32.mrb[141].mxu1 }
 0x202   :  { %v1435_v20 = vpop.f32.mrb[142].mxu0  ;;  %v1964_v21 = vpop.f32.mrb[142].mxu1  ;;  %v5092_v2 = vld [vmem:[#allocation7_spill] sm:$0xff]  ;;  %v5093_v24 = vld [vmem:[#allocation8_spill] sm:$0xff] }
 0x203   :  { %2449 = vst.msk [vmem:[%s4955_s3 + $0x48] sm:$0xf] %vm2430_vm4, %v2904_v56  ;;  %v2905_v4 = vpack.c.bf16 %v2203_v57, %v2203_v57  ;;  %v2099_v3 = vmax.f32 %v1570_v54, %v1961_v15  ;;  %v1571_v47 = vmax.f32 %v5082_v43, %v1435_v20  ;;  %v3328_v37 = vpop.f32.mrb[143].mxu0  ;;  %v3438_v38 = vpop.f32.mrb[143].mxu1  ;;  %v5094_v20 = vmax.f32 %v5092_v2, %v5093_v24 }
 0x205   :  { %2450 = vst.msk [vmem:[%s4955_s3 + $0x4c] sm:$0xf] %vm2430_vm4, %v2905_v4  ;;  %v2155_v28 = vadd.f32 %v4561_v27, %v2099_v3  ;;  %v2100_v29 = vmax.f32 %v1571_v47, %v1964_v21 }
 0x207   :  { %v2204_v39 = vmax.f32 %v2155_v28, 0.0  ;;  %v2156_v40 = vadd.f32 %v4561_v27, %v2100_v29  ;;  %v5095_v28 = vld [vmem:[#allocation9_spill] sm:$0xff]  ;;  %v5096_v29 = vld [vmem:[#allocation10_spill] sm:$0xff] }
 0x208   :  { %v1440_v61 = vpop.f32.mrb[144].mxu0  ;;  %v1969_v62 = vpop.f32.mrb[144].mxu1 }
 0x209   :  { %v2906_v59 = vpack.c.bf16 %v2204_v39, %v2204_v39  ;;  %v2205_v60 = vmax.f32 %v2156_v40, 0.0  ;;  %v1572_v31 = vmax.f32 %v5083_v48, %v1440_v61  ;;  %v3331_v46 = vpop.f32.mrb[145].mxu0  ;;  %v3441_v8 = vpop.f32.mrb[145].mxu1  ;;  %v5097_v39 = vmax.f32 %v5095_v28, %v5096_v29  ;;  %v5111_v28 = vld [vmem:[#allocation20_spill] sm:$0xff] }
 0x20a   :  { %v1443_v9 = vpop.f32.mrb[146].mxu0  ;;  %v1972_v34 = vpop.f32.mrb[146].mxu1 }
 0x20b   :  { %2451 = vst.msk [vmem:[%s4955_s3 + $0x50] sm:$0xf] %vm2430_vm4, %v2906_v59  ;;  %v2907_v44 = vpack.c.bf16 %v2205_v60, %v2205_v60  ;;  %v2101_v45 = vmax.f32 %v1572_v31, %v1969_v62  ;;  %v1573_v0 = vmax.f32 %v5085_v12, %v1443_v9  ;;  %v3332_v22 = vpop.f32.mrb[147].mxu0  ;;  %v3442_v7 = vpop.f32.mrb[147].mxu1 }
 0x20d   :  { %2452 = vst.msk [vmem:[%s4955_s3 + $0x54] sm:$0xf] %vm2430_vm4, %v2907_v44  ;;  %v2157_v52 = vadd.f32 %v4561_v27, %v2101_v45  ;;  %v2102_v18 = vmax.f32 %v1573_v0, %v1972_v34  ;;  %v5098_v44 = vld [vmem:[#allocation11_spill] sm:$0xff]  ;;  %v5099_v45 = vld [vmem:[#allocation12_spill] sm:$0xff] }
 0x20e   :  { %v5100_v11 = vmax.f32 %v5098_v44, %v5099_v45 }
 0x20f   :  { %v2206_v17 = vmax.f32 %v2157_v52, 0.0  ;;  %v2158_v25 = vadd.f32 %v4561_v27, %v2102_v18 }
 0x210   :  { %v1448_v26 = vpop.f32.mrb[148].mxu0  ;;  %v1977_v51 = vpop.f32.mrb[148].mxu1 }
 0x211   :  { %v2908_v6 = vpack.c.bf16 %v2206_v17, %v2206_v17  ;;  %v2207_v16 = vmax.f32 %v2158_v25, 0.0  ;;  %v1574_v42 = vmax.f32 %v5088_v41, %v1448_v26  ;;  %v3335_v13 = vpop.f32.mrb[149].mxu0  ;;  %v3445_v14 = vpop.f32.mrb[149].mxu1  ;;  %v5101_v25 = vld [vmem:[#allocation13_spill] sm:$0xff]  ;;  %v5102_v26 = vld [vmem:[#allocation14_spill] sm:$0xff] }
 0x212   :  { %v1451_v19 = vpop.f32.mrb[150].mxu0  ;;  %v1980_v23 = vpop.f32.mrb[150].mxu1 }
 0x213   :  { %2453 = vst.msk [vmem:[%s4955_s3 + $0x58] sm:$0xf] %vm2430_vm4, %v2908_v6  ;;  %v2909_v49 = vpack.c.bf16 %v2207_v16, %v2207_v16  ;;  %v2103_v50 = vmax.f32 %v1574_v42, %v1977_v51  ;;  %v1575_v10 = vmax.f32 %v5091_v63, %v1451_v19  ;;  %v3336_v55 = vpop.f32.mrb[151].mxu0  ;;  %v3446_v5 = vpop.f32.mrb[151].mxu1  ;;  %v5103_v51 = vmax.f32 %v5101_v25, %v5102_v26  ;;  %v5117_v25 = vld [vmem:[#allocation24_spill] sm:$0xff] }
 0x215   :  { %2454 = vst.msk [vmem:[%s4955_s3 + $0x5c] sm:$0xf] %vm2430_vm4, %v2909_v49  ;;  %v2159_v35 = vadd.f32 %v4561_v27, %v2103_v50  ;;  %v2104_v36 = vmax.f32 %v1575_v10, %v1980_v23  ;;  %v5104_v50 = vld [vmem:[#allocation15_spill] sm:$0xff] }
 0x216   :  { %v5106_v33 = vmax.f32 %v5104_v50, %v5105_v32 }
 0x217   :  { %v2208_v1 = vmax.f32 %v2159_v35, 0.0  ;;  %v2160_v15 = vadd.f32 %v4561_v27, %v2104_v36 }
 0x218   :  { %v1456_v56 = vpop.f32.mrb[152].mxu0  ;;  %v1985_v57 = vpop.f32.mrb[152].mxu1 }
 0x219   :  { %v2910_v53 = vpack.c.bf16 %v2208_v1, %v2208_v1  ;;  %v2209_v54 = vmax.f32 %v2160_v15, 0.0  ;;  %v1576_v21 = vmax.f32 %v5094_v20, %v1456_v56  ;;  %v3339_v4 = vpop.f32.mrb[153].mxu0  ;;  %v3449_v3 = vpop.f32.mrb[153].mxu1  ;;  %v5107_v15 = vld [vmem:[#allocation17_spill] sm:$0xff]  ;;  %v5108_v56 = vld [vmem:[#allocation18_spill] sm:$0xff] }
 0x21a   :  { %v1459_v43 = vpop.f32.mrb[154].mxu0  ;;  %v1988_v47 = vpop.f32.mrb[154].mxu1 }
 0x21b   :  { %2455 = vst.msk [vmem:[%s4955_s3 + $0x60] sm:$0xf] %vm2430_vm4, %v2910_v53  ;;  %v2911_v37 = vpack.c.bf16 %v2209_v54, %v2209_v54  ;;  %v2105_v38 = vmax.f32 %v1576_v21, %v1985_v57  ;;  %v1577_v40 = vmax.f32 %v5097_v39, %v1459_v43  ;;  %v3340_v61 = vpop.f32.mrb[155].mxu0  ;;  %v3450_v62 = vpop.f32.mrb[155].mxu1  ;;  %v5109_v57 = vmax.f32 %v5107_v15, %v5108_v56  ;;  %v5123_v15 = vld [vmem:[#allocation28_spill] sm:$0xff] }
 0x21d   :  { %2456 = vst.msk [vmem:[%s4955_s3 + $0x64] sm:$0xf] %vm2430_vm4, %v2911_v37  ;;  %v2161_v59 = vadd.f32 %v4561_v27, %v2105_v38  ;;  %v2106_v60 = vmax.f32 %v1577_v40, %v1988_v47  ;;  %v5110_v38 = vld [vmem:[#allocation19_spill] sm:$0xff] }
 0x21e   :  { %v5112_v29 = vmax.f32 %v5110_v38, %v5111_v28 }
 0x21f   :  { %v2210_v48 = vmax.f32 %v2161_v59, 0.0  ;;  %v2162_v31 = vadd.f32 %v4561_v27, %v2106_v60 }
 0x220   :  { %v1464_v46 = vpop.f32.mrb[156].mxu0  ;;  %v1993_v8 = vpop.f32.mrb[156].mxu1 }
 0x221   :  { %v2912_v9 = vpack.c.bf16 %v2210_v48, %v2210_v48  ;;  %v2211_v34 = vmax.f32 %v2162_v31, 0.0  ;;  %v1578_v12 = vmax.f32 %v5100_v11, %v1464_v46  ;;  %v3343_v0 = vpop.f32.mrb[157].mxu0  ;;  %v3453_v22 = vpop.f32.mrb[157].mxu1  ;;  %v5113_v31 = vld [vmem:[#allocation21_spill] sm:$0xff]  ;;  %v5114_v46 = vld [vmem:[#allocation22_spill] sm:$0xff] }
 0x222   :  { %v1467_v7 = vpop.f32.mrb[158].mxu0  ;;  %v1996_v52 = vpop.f32.mrb[158].mxu1 }
 0x223   :  { %2457 = vst.msk [vmem:[%s4955_s3 + $0x68] sm:$0xf] %vm2430_vm4, %v2912_v9  ;;  %v2913_v18 = vpack.c.bf16 %v2211_v34, %v2211_v34  ;;  %v2107_v17 = vmax.f32 %v1578_v12, %v1993_v8  ;;  %v1579_v6 = vmax.f32 %v5103_v51, %v1467_v7  ;;  %v3344_v16 = vpop.f32.mrb[159].mxu0  ;;  %v3454_v58 = vpop.f32.mrb[159].mxu1  ;;  %v5115_v8 = vmax.f32 %v5113_v31, %v5114_v46  ;;  %v5129_v31 = vld [vmem:[#allocation32_spill] sm:$0xff] }
 0x225   :  { %2458 = vst.msk [vmem:[%s4955_s3 + $0x6c] sm:$0xf] %vm2430_vm4, %v2913_v18  ;;  %v2163_v30 = vadd.f32 %v4561_v27, %v2107_v17  ;;  %v2108_v41 = vmax.f32 %v1579_v6, %v1996_v52  ;;  %v5116_v17 = vld [vmem:[#allocation23_spill] sm:$0xff] }
 0x226   :  { %v5118_v26 = vmax.f32 %v5116_v17, %v5117_v25 }
 0x227   :  { %v2212_v42 = vmax.f32 %v2163_v30, 0.0  ;;  %v2164_v13 = vadd.f32 %v4561_v27, %v2108_v41 }
 0x228   :  { %v1472_v14 = vpop.f32.mrb[160].mxu0  ;;  %v2001_v19 = vpop.f32.mrb[160].mxu1 }
 0x229   :  { %v2914_v23 = vpack.c.bf16 %v2212_v42, %v2212_v42  ;;  %v2213_v49 = vmax.f32 %v2164_v13, 0.0  ;;  %v1580_v63 = vmax.f32 %v5106_v33, %v1472_v14  ;;  %v3347_v10 = vpop.f32.mrb[161].mxu0  ;;  %v3457_v55 = vpop.f32.mrb[161].mxu1  ;;  %v5119_v13 = vld [vmem:[#allocation25_spill] sm:$0xff]  ;;  %v5120_v14 = vld [vmem:[#allocation26_spill] sm:$0xff] }
 0x22a   :  { %v1475_v5 = vpop.f32.mrb[162].mxu0  ;;  %v2004_v35 = vpop.f32.mrb[162].mxu1 }
 0x22b   :  { %2459 = vst.msk [vmem:[%s4955_s3 + $0x70] sm:$0xf] %vm2430_vm4, %v2914_v23  ;;  %v2915_v36 = vpack.c.bf16 %v2213_v49, %v2213_v49  ;;  %v2109_v1 = vmax.f32 %v1580_v63, %v2001_v19  ;;  %v1581_v53 = vmax.f32 %v5109_v57, %v1475_v5  ;;  %v3348_v54 = vpop.f32.mrb[163].mxu0  ;;  %v3458_v2 = vpop.f32.mrb[163].mxu1  ;;  %v5121_v19 = vmax.f32 %v5119_v13, %v5120_v14  ;;  %v5135_v13 = vld [vmem:[#allocation36_spill] sm:$0xff] }
 0x22d   :  { %2460 = vst.msk [vmem:[%s4955_s3 + $0x74] sm:$0xf] %vm2430_vm4, %v2915_v36  ;;  %v2165_v24 = vadd.f32 %v4561_v27, %v2109_v1  ;;  %v2110_v20 = vmax.f32 %v1581_v53, %v2004_v35  ;;  %v5122_v1 = vld [vmem:[#allocation27_spill] sm:$0xff] }
 0x22e   :  { %v5124_v56 = vmax.f32 %v5122_v1, %v5123_v15 }
 0x22f   :  { %v2214_v21 = vmax.f32 %v2165_v24, 0.0  ;;  %v2166_v4 = vadd.f32 %v4561_v27, %v2110_v20 }
 0x230   :  { %v1480_v3 = vpop.f32.mrb[164].mxu0  ;;  %v2009_v43 = vpop.f32.mrb[164].mxu1 }
 0x231   :  { %v2916_v47 = vpack.c.bf16 %v2214_v21, %v2214_v21  ;;  %v2215_v37 = vmax.f32 %v2166_v4, 0.0  ;;  %v1582_v39 = vmax.f32 %v5112_v29, %v1480_v3  ;;  %v3351_v40 = vpop.f32.mrb[165].mxu0  ;;  %v3461_v61 = vpop.f32.mrb[165].mxu1  ;;  %v5125_v4 = vld [vmem:[#allocation29_spill] sm:$0xff]  ;;  %v5126_v3 = vld [vmem:[#allocation30_spill] sm:$0xff] }
 0x232   :  { %v1483_v62 = vpop.f32.mrb[166].mxu0  ;;  %v2012_v59 = vpop.f32.mrb[166].mxu1 }
 0x233   :  { %2461 = vst.msk [vmem:[%s4955_s3 + $0x78] sm:$0xf] %vm2430_vm4, %v2916_v47  ;;  %v2917_v60 = vpack.c.bf16 %v2215_v37, %v2215_v37  ;;  %v2111_v48 = vmax.f32 %v1582_v39, %v2009_v43  ;;  %v1583_v9 = vmax.f32 %v5115_v8, %v1483_v62  ;;  %v3352_v34 = vpop.f32.mrb[167].mxu0  ;;  %v3462_v44 = vpop.f32.mrb[167].mxu1  ;;  %v5127_v43 = vmax.f32 %v5125_v4, %v5126_v3  ;;  %v5141_v4 = vld [vmem:[#allocation40_spill] sm:$0xff] }
 0x235   :  { %2462 = vst.msk [vmem:[%s4955_s3 + $0x7c] sm:$0xf] %vm2430_vm4, %v2917_v60  ;;  %v2167_v45 = vadd.f32 %v4561_v27, %v2111_v48  ;;  %v2112_v11 = vmax.f32 %v1583_v9, %v2012_v59  ;;  %v5128_v48 = vld [vmem:[#allocation31_spill] sm:$0xff] }
 0x236   :  { %v5130_v46 = vmax.f32 %v5128_v48, %v5129_v31 }
 0x237   :  { %v2216_v12 = vmax.f32 %v2167_v45, 0.0  ;;  %v2168_v0 = vadd.f32 %v4561_v27, %v2112_v11 }
 0x238   :  { %v1488_v22 = vpop.f32.mrb[168].mxu0  ;;  %v2017_v7 = vpop.f32.mrb[168].mxu1 }
 0x239   :  { %v2918_v52 = vpack.c.bf16 %v2216_v12, %v2216_v12  ;;  %v2217_v18 = vmax.f32 %v2168_v0, 0.0  ;;  %v1584_v51 = vmax.f32 %v5118_v26, %v1488_v22  ;;  %v3355_v6 = vpop.f32.mrb[169].mxu0  ;;  %v3465_v16 = vpop.f32.mrb[169].mxu1  ;;  %v5131_v0 = vld [vmem:[#allocation33_spill] sm:$0xff]  ;;  %v5132_v22 = vld [vmem:[#allocation34_spill] sm:$0xff] }
 0x23a   :  { %v1491_v58 = vpop.f32.mrb[170].mxu0  ;;  %v2020_v30 = vpop.f32.mrb[170].mxu1 }
 0x23b   :  { %2463 = vst.msk [vmem:[%s4955_s3 + $0x80] sm:$0xf] %vm2430_vm4, %v2918_v52  ;;  %v2919_v41 = vpack.c.bf16 %v2217_v18, %v2217_v18  ;;  %v2113_v42 = vmax.f32 %v1584_v51, %v2017_v7  ;;  %v1585_v23 = vmax.f32 %v5121_v19, %v1491_v58  ;;  %v3356_v49 = vpop.f32.mrb[171].mxu0  ;;  %v3466_v50 = vpop.f32.mrb[171].mxu1  ;;  %v5133_v7 = vmax.f32 %v5131_v0, %v5132_v22  ;;  %v5147_v0 = vld [vmem:[#allocation44_spill] sm:$0xff] }
 0x23d   :  { %2464 = vst.msk [vmem:[%s4955_s3 + $0x84] sm:$0xf] %vm2430_vm4, %v2919_v41  ;;  %v2169_v32 = vadd.f32 %v4561_v27, %v2113_v42  ;;  %v2114_v33 = vmax.f32 %v1585_v23, %v2020_v30  ;;  %v5134_v42 = vld [vmem:[#allocation35_spill] sm:$0xff] }
 0x23e   :  { %v5136_v14 = vmax.f32 %v5134_v42, %v5135_v13 }
 0x23f   :  { %v2218_v63 = vmax.f32 %v2169_v32, 0.0  ;;  %v2170_v10 = vadd.f32 %v4561_v27, %v2114_v33 }
 0x240   :  { %v1496_v55 = vpop.f32.mrb[172].mxu0  ;;  %v2025_v5 = vpop.f32.mrb[172].mxu1 }
 0x241   :  { %v2920_v35 = vpack.c.bf16 %v2218_v63, %v2218_v63  ;;  %v2219_v36 = vmax.f32 %v2170_v10, 0.0  ;;  %v1586_v57 = vmax.f32 %v5124_v56, %v1496_v55  ;;  %v3359_v53 = vpop.f32.mrb[173].mxu0  ;;  %v3469_v54 = vpop.f32.mrb[173].mxu1  ;;  %v5137_v10 = vld [vmem:[#allocation37_spill] sm:$0xff]  ;;  %v5138_v55 = vld [vmem:[#allocation38_spill] sm:$0xff] }
 0x242   :  { %v1499_v2 = vpop.f32.mrb[174].mxu0  ;;  %v2028_v24 = vpop.f32.mrb[174].mxu1 }
 0x243   :  { %2465 = vst.msk [vmem:[%s4955_s3 + $0x88] sm:$0xf] %vm2430_vm4, %v2920_v35  ;;  %v2921_v20 = vpack.c.bf16 %v2219_v36, %v2219_v36  ;;  %v2115_v21 = vmax.f32 %v1586_v57, %v2025_v5  ;;  %v1587_v47 = vmax.f32 %v5127_v43, %v1499_v2  ;;  %v3360_v37 = vpop.f32.mrb[175].mxu0  ;;  %v3470_v38 = vpop.f32.mrb[175].mxu1  ;;  %v5139_v5 = vmax.f32 %v5137_v10, %v5138_v55  ;;  %v5153_v10 = vld [vmem:[#allocation48_spill] sm:$0xff] }
 0x245   :  { %2466 = vst.msk [vmem:[%s4955_s3 + $0x8c] sm:$0xf] %vm2430_vm4, %v2921_v20  ;;  %v2171_v28 = vadd.f32 %v4561_v27, %v2115_v21  ;;  %v2116_v29 = vmax.f32 %v1587_v47, %v2028_v24  ;;  %v5140_v21 = vld [vmem:[#allocation39_spill] sm:$0xff] }
 0x246   :  { %v5142_v3 = vmax.f32 %v5140_v21, %v5141_v4 }
 0x247   :  { %v2220_v39 = vmax.f32 %v2171_v28, 0.0  ;;  %v2172_v40 = vadd.f32 %v4561_v27, %v2116_v29 }
 0x248   :  { %v1504_v61 = vpop.f32.mrb[176].mxu0  ;;  %v2033_v62 = vpop.f32.mrb[176].mxu1 }
 0x249   :  { %v2922_v59 = vpack.c.bf16 %v2220_v39, %v2220_v39  ;;  %v2221_v60 = vmax.f32 %v2172_v40, 0.0  ;;  %v1588_v8 = vmax.f32 %v5130_v46, %v1504_v61  ;;  %v3363_v9 = vpop.f32.mrb[177].mxu0  ;;  %v3473_v34 = vpop.f32.mrb[177].mxu1  ;;  %v5143_v40 = vld [vmem:[#allocation41_spill] sm:$0xff]  ;;  %v5144_v61 = vld [vmem:[#allocation42_spill] sm:$0xff] }
 0x24a   :  { %v1507_v44 = vpop.f32.mrb[178].mxu0  ;;  %v2036_v45 = vpop.f32.mrb[178].mxu1 }
 0x24b   :  { %2467 = vst.msk [vmem:[%s4955_s3 + $0x90] sm:$0xf] %vm2430_vm4, %v2922_v59  ;;  %v2923_v11 = vpack.c.bf16 %v2221_v60, %v2221_v60  ;;  %v2117_v12 = vmax.f32 %v1588_v8, %v2033_v62  ;;  %v1589_v52 = vmax.f32 %v5133_v7, %v1507_v44  ;;  %v3364_v18 = vpop.f32.mrb[179].mxu0  ;;  %v3474_v17 = vpop.f32.mrb[179].mxu1  ;;  %v5145_v62 = vmax.f32 %v5143_v40, %v5144_v61  ;;  %v5159_v40 = vld [vmem:[#allocation52_spill] sm:$0xff] }
 0x24d   :  { %2468 = vst.msk [vmem:[%s4955_s3 + $0x94] sm:$0xf] %vm2430_vm4, %v2923_v11  ;;  %v2173_v25 = vadd.f32 %v4561_v27, %v2117_v12  ;;  %v2118_v26 = vmax.f32 %v1589_v52, %v2036_v45  ;;  %v5146_v12 = vld [vmem:[#allocation43_spill] sm:$0xff] }
 0x24e   :  { %v5148_v22 = vmax.f32 %v5146_v12, %v5147_v0 }
 0x24f   :  { %v2222_v51 = vmax.f32 %v2173_v25, 0.0  ;;  %v2174_v6 = vadd.f32 %v4561_v27, %v2118_v26 }
 0x250   :  { %v1512_v16 = vpop.f32.mrb[180].mxu0  ;;  %v2041_v58 = vpop.f32.mrb[180].mxu1 }
 0x251   :  { %v2924_v30 = vpack.c.bf16 %v2222_v51, %v2222_v51  ;;  %v2223_v41 = vmax.f32 %v2174_v6, 0.0  ;;  %v1590_v19 = vmax.f32 %v5136_v14, %v1512_v16  ;;  %v3367_v23 = vpop.f32.mrb[181].mxu0  ;;  %v3477_v49 = vpop.f32.mrb[181].mxu1  ;;  %v5149_v6 = vld [vmem:[#allocation45_spill] sm:$0xff]  ;;  %v5150_v16 = vld [vmem:[#allocation46_spill] sm:$0xff] }
 0x252   :  { %v1515_v50 = vpop.f32.mrb[182].mxu0  ;;  %v2044_v32 = vpop.f32.mrb[182].mxu1 }
 0x253   :  { %2469 = vst.msk [vmem:[%s4955_s3 + $0x98] sm:$0xf] %vm2430_vm4, %v2924_v30  ;;  %v2925_v33 = vpack.c.bf16 %v2223_v41, %v2223_v41  ;;  %v2119_v63 = vmax.f32 %v1590_v19, %v2041_v58  ;;  %v1591_v35 = vmax.f32 %v5139_v5, %v1515_v50  ;;  %v3368_v36 = vpop.f32.mrb[183].mxu0  ;;  %v3478_v1 = vpop.f32.mrb[183].mxu1  ;;  %v5151_v58 = vmax.f32 %v5149_v6, %v5150_v16 }
 0x255   :  { %2470 = vst.msk [vmem:[%s4955_s3 + $0x9c] sm:$0xf] %vm2430_vm4, %v2925_v33  ;;  %v2175_v15 = vadd.f32 %v4561_v27, %v2119_v63  ;;  %v2120_v56 = vmax.f32 %v1591_v35, %v2044_v32  ;;  %v5152_v63 = vld [vmem:[#allocation47_spill] sm:$0xff] }
 0x256   :  { %v5154_v55 = vmax.f32 %v5152_v63, %v5153_v10 }
 0x257   :  { %v2224_v57 = vmax.f32 %v2175_v15, 0.0  ;;  %v2176_v53 = vadd.f32 %v4561_v27, %v2120_v56 }
 0x258   :  { %v1520_v54 = vpop.f32.mrb[184].mxu0  ;;  %v2049_v2 = vpop.f32.mrb[184].mxu1 }
 0x259   :  { %v2926_v24 = vpack.c.bf16 %v2224_v57, %v2224_v57  ;;  %v2225_v20 = vmax.f32 %v2176_v53, 0.0  ;;  %v1592_v43 = vmax.f32 %v5142_v3, %v1520_v54  ;;  %v3371_v47 = vpop.f32.mrb[185].mxu0  ;;  %v3481_v37 = vpop.f32.mrb[185].mxu1  ;;  %v5155_v53 = vld [vmem:[#allocation49_spill] sm:$0xff]  ;;  %v5156_v54 = vld [vmem:[#allocation50_spill] sm:$0xff] }
 0x25a   :  { %v1523_v38 = vpop.f32.mrb[186].mxu0  ;;  %v2052_v28 = vpop.f32.mrb[186].mxu1 }
 0x25b   :  { %2471 = vst.msk [vmem:[%s4955_s3 + $0xa0] sm:$0xf] %vm2430_vm4, %v2926_v24  ;;  %v2927_v29 = vpack.c.bf16 %v2225_v20, %v2225_v20  ;;  %v2121_v39 = vmax.f32 %v1592_v43, %v2049_v2  ;;  %v1593_v59 = vmax.f32 %v5145_v62, %v1523_v38  ;;  %v3372_v60 = vpop.f32.mrb[187].mxu0  ;;  %v3482_v48 = vpop.f32.mrb[187].mxu1  ;;  %v5157_v2 = vmax.f32 %v5155_v53, %v5156_v54 }
 0x25d   :  { %2472 = vst.msk [vmem:[%s4955_s3 + $0xa4] sm:$0xf] %vm2430_vm4, %v2927_v29  ;;  %v2177_v31 = vadd.f32 %v4561_v27, %v2121_v39  ;;  %v2122_v46 = vmax.f32 %v1593_v59, %v2052_v28  ;;  %v5158_v39 = vld [vmem:[#allocation51_spill] sm:$0xff] }
 0x25e   :  { %v5160_v61 = vmax.f32 %v5158_v39, %v5159_v40 }
 0x25f   :  { %v2226_v8 = vmax.f32 %v2177_v31, 0.0  ;;  %v2178_v9 = vadd.f32 %v4561_v27, %v2122_v46 }
 0x260   :  { %v1528_v34 = vpop.f32.mrb[188].mxu0  ;;  %v2057_v44 = vpop.f32.mrb[188].mxu1 }
 0x261   :  { %v2928_v45 = vpack.c.bf16 %v2226_v8, %v2226_v8  ;;  %v2227_v11 = vmax.f32 %v2178_v9, 0.0  ;;  %v1594_v7 = vmax.f32 %v5148_v22, %v1528_v34  ;;  %v3375_v52 = vpop.f32.mrb[189].mxu0  ;;  %v3485_v18 = vpop.f32.mrb[189].mxu1 }
 0x262   :  { %v1531_v17 = vpop.f32.mrb[190].mxu0  ;;  %v2060_v25 = vpop.f32.mrb[190].mxu1 }
 0x263   :  { %2473 = vst.msk [vmem:[%s4955_s3 + $0xa8] sm:$0xf] %vm2430_vm4, %v2928_v45  ;;  %v2929_v26 = vpack.c.bf16 %v2227_v11, %v2227_v11  ;;  %v2123_v51 = vmax.f32 %v1594_v7, %v2057_v44  ;;  %v1595_v30 = vmax.f32 %v5151_v58, %v1531_v17  ;;  %v3376_v41 = vpop.f32.mrb[191].mxu0  ;;  %v3486_v42 = vpop.f32.mrb[191].mxu1 }
 0x265   :  { %2474 = vst.msk [vmem:[%s4955_s3 + $0xac] sm:$0xf] %vm2430_vm4, %v2929_v26  ;;  %v2179_v13 = vadd.f32 %v4561_v27, %v2123_v51  ;;  %v2124_v14 = vmax.f32 %v1595_v30, %v2060_v25 }
 0x267   :  { %v2228_v19 = vmax.f32 %v2179_v13, 0.0  ;;  %v2180_v23 = vadd.f32 %v4561_v27, %v2124_v14 }
 0x268   :  { %v1536_v49 = vpop.f32.mrb[192].mxu0  ;;  %v2065_v50 = vpop.f32.mrb[192].mxu1 }
 0x269   :  { %v2930_v32 = vpack.c.bf16 %v2228_v19, %v2228_v19  ;;  %v2229_v33 = vmax.f32 %v2180_v23, 0.0  ;;  %v1596_v5 = vmax.f32 %v5154_v55, %v1536_v49  ;;  %v3379_v35 = vpop.f32.mrb[193].mxu0  ;;  %v3489_v36 = vpop.f32.mrb[193].mxu1 }
 0x26a   :  { %v1539_v1 = vpop.f32.mrb[194].mxu0  ;;  %v2068_v15 = vpop.f32.mrb[194].mxu1 }
 0x26b   :  { %2475 = vst.msk [vmem:[%s4955_s3 + $0xb0] sm:$0xf] %vm2430_vm4, %v2930_v32  ;;  %v2931_v56 = vpack.c.bf16 %v2229_v33, %v2229_v33  ;;  %v2125_v57 = vmax.f32 %v1596_v5, %v2065_v50  ;;  %v1597_v24 = vmax.f32 %v5157_v2, %v1539_v1  ;;  %v3380_v20 = vpop.f32.mrb[195].mxu0  ;;  %v3490_v21 = vpop.f32.mrb[195].mxu1 }
 0x26d   :  { %2476 = vst.msk [vmem:[%s4955_s3 + $0xb4] sm:$0xf] %vm2430_vm4, %v2931_v56  ;;  %v2181_v4 = vadd.f32 %v4561_v27, %v2125_v57  ;;  %v2126_v3 = vmax.f32 %v1597_v24, %v2068_v15 }
 0x26f   :  { %v2230_v43 = vmax.f32 %v2181_v4, 0.0  ;;  %v2182_v47 = vadd.f32 %v4561_v27, %v2126_v3 }
 0x270   :  { %v1544_v37 = vpop.f32.mrb[196].mxu0  ;;  %v2073_v38 = vpop.f32.mrb[196].mxu1 }
 0x271   :  { %v2932_v28 = vpack.c.bf16 %v2230_v43, %v2230_v43  ;;  %v2231_v29 = vmax.f32 %v2182_v47, 0.0  ;;  %v1598_v62 = vmax.f32 %v5160_v61, %v1544_v37  ;;  %v3383_v59 = vpop.f32.mrb[197].mxu0  ;;  %v3493_v60 = vpop.f32.mrb[197].mxu1 }
 0x272   :  { %v1547_v48 = vpop.f32.mrb[198].mxu0  ;;  %v2076_v31 = vpop.f32.mrb[198].mxu1 }
 0x273   :  { %2477 = vst.msk [vmem:[%s4955_s3 + $0xb8] sm:$0xf] %vm2430_vm4, %v2932_v28  ;;  %v2933_v46 = vpack.c.bf16 %v2231_v29, %v2231_v29  ;;  %v2127_v8 = vmax.f32 %v1598_v62, %v2073_v38  ;;  %v3384_v9 = vpop.f32.mrb[199].mxu0  ;;  %v3494_v34 = vpop.f32.mrb[199].mxu1 }
 0x275   :  { %2478 = vst.msk [vmem:[%s4955_s3 + $0xbc] sm:$0xf] %vm2430_vm4, %v2933_v46  ;;  %v2183_v44 = vadd.f32 %v4561_v27, %v2127_v8 }
 0x277   :  { %v2232_v45 = vmax.f32 %v2183_v44, 0.0 }
 0x279   :  { %v2934_v11 = vpack.c.bf16 %v2232_v45, %v2232_v45 }
 0x27b   :  { %2479 = vst.msk [vmem:[%s4955_s3 + $0xc0] sm:$0xf] %vm2430_vm4, %v2934_v11 }

// kernel: net_forward.4
= control target key start
LH: loop header
LB: loop body
LE: loop exit
PB: predicated region body
PF: predicated region fallthrough
CT: control target
= control target key end

     0   :  { %v796_v0 = vmov 0   ;;  %vm131_vm0 = vcmask 179200   ;;  %vm144_vm1 = vcmask 1042432   ;;  %vm634_vm2 = vcmask 125952   ;;  %s1104_s1 = inlined_call_operand.vmem [shape: bf16[150,16], index: 1, kind: input, shape index: {}]   ;;  %s1105_s0 = inlined_call_operand.vmem [shape: bf16[4,50,150], index: 0, kind: input, shape index: {}]   ;;  %s1106_s2 = inlined_call_operand.vmem [shape: f32[1,16], index: 2, kind: input, shape index: {}]   ;;  %s1107_s3 = inlined_call_operand.vmem [shape: bf16[50,16], index: 3, kind: output, shape index: {}]  }
   0x1   :  { %148 = vmatprep.subr.bf16.mxu0 %v796_v0  ;;  %265 = vmatprep.subr.bf16.mxu1 %v796_v0  ;;  %v822_v1 = vld [vmem:[%s1104_s1] sm:$0xff]   ;;  %v829_v2 = vld [vmem:[%s1104_s1 + $0x8] sm:$0xff]   ;;  %v838_v3 = vld [vmem:[%s1104_s1 + $0x10] sm:$0xff]   ;;  %vm641_vm3 = vcmask 122880  }
   0x2   :  { %149 = vmatpush1.bf16.msra.mxu0 %v822_v1  ;;  %266 = vmatpush1.bf16.msra.mxu1 %v822_v1  ;;  %v847_v4 = vld [vmem:[%s1104_s1 + $0x18] sm:$0xff]   ;;  %v754_v5 = vld [vmem:[%s1105_s0 + $0x4] ss:$8 sps:$4 sm:$0xff]   ;;  %v882_v9 = vld [vmem:[%s1104_s1 + $0x30] sm:$0xff]  }
   0x3   :  { %150 = vmatprep.subr.bf16.mxu0 %v796_v0  ;;  %267 = vmatprep.subr.bf16.mxu1 %v796_v0  ;;  %v757_v6 = vld [vmem:[%s1105_s0 + $0x3c] ss:$8 sps:$4 sm:$0xff]   ;;  %v873_v8 = vld [vmem:[%s1104_s1 + $0x28] sm:$0xff]   ;;  %v755_v15 = vld [vmem:[%s1105_s0 + $0x38] ss:$8 sps:$4 sm:$0xff]  }
   0x4   :  { %665 = vmatprep.mubr.msk.bf16.mxu0 %vm131_vm0, %v754_v5  ;;  %v863_v7 = vld [vmem:[%s1104_s1 + $0x20] sm:$0xff]   ;;  %684 = vmatprep.mubr.msk.bf16.mxu1 %vm131_vm0, %v757_v6  ;;  %v891_v10 = vld [vmem:[%s1104_s1 + $0x38] sm:$0xff]   ;;  %v751_v12 = vld [vmem:[%s1104_s1 + $0x48] ss:$0 sps:$4 sm:$0x77]  }
   0x5   :  { %v900_v11 = vld [vmem:[%s1104_s1 + $0x40] sm:$0xff]   ;;  %v911_v13 = vsel %vm144_vm1, %v751_v12, 0  ;;  %v758_v16 = vld [vmem:[%s1105_s0 + $0x14] ss:$8 sps:$4 sm:$0xff]   ;;  %v760_v18 = vld [vmem:[%s1105_s0 + $0x10] ss:$8 sps:$4 sm:$0xff]  }
   0x6   :  { %151 = vmatpush1.bf16.msra.mxu0 %v829_v2  ;;  %268 = vmatpush1.bf16.msra.mxu1 %v829_v2  ;;  %v752_v14 = vld [vmem:[%s1105_s0] ss:$8 sps:$4 sm:$0xff]   ;;  %v761_v17 = vld [vmem:[%s1105_s0 + $0x4c] ss:$8 sps:$4 sm:$0xff]   ;;  %v767_v21 = vld [vmem:[%s1105_s0 + $0x5c] ss:$8 sps:$4 sm:$0xff]  }
   0x7   :  { %152 = vmatprep.subr.bf16.mxu0 %v796_v0  ;;  %269 = vmatprep.subr.bf16.mxu1 %v796_v0  ;;  %v763_v19 = vld [vmem:[%s1105_s0 + $0x48] ss:$8 sps:$4 sm:$0xff]   ;;  %v764_v20 = vld [vmem:[%s1105_s0 + $0x24] ss:$8 sps:$4 sm:$0xff]   ;;  %v769_v23 = vld [vmem:[%s1105_s0 + $0x58] ss:$8 sps:$4 sm:$0xff]  }
   0x8   :  { %v766_v22 = vld [vmem:[%s1105_s0 + $0x20] ss:$8 sps:$4 sm:$0xff]   ;;  %v40_v24 = vld [vmem:[%s1105_s0 + $0x30] sm:$0x11]  ;;  %v780_v34 = vld [vmem:[%s1105_s0 + $0x84] ss:$8 sps:$4 sm:$0xff]  }
   0x9   :  { %v675_v25 = vld [vmem:[%s1105_s0 + $0x68] sm:$0x11]  ;;  %v654_v26 = vcombine.high %v40_v24, %v40_v24  ;;  %v653_v28 = vcombine.low %v40_v24, %v40_v24  ;;  %v776_v30 = vld [vmem:[%s1105_s0 + $0x74] ss:$8 sps:$4 sm:$0xff]   ;;  %v774_v32 = vld [vmem:[%s1105_s0 + $0x70] ss:$8 sps:$4 sm:$0xff]  }
   0xa   :  { %153 = vmatpush1.bf16.msra.mxu0 %v838_v3  ;;  %270 = vmatpush1.bf16.msra.mxu1 %v838_v3  ;;  %v683_v27 = vcombine.high %v675_v25, %v675_v25  ;;  %v682_v29 = vcombine.low %v675_v25, %v675_v25  ;;  %v779_v31 = vld [vmem:[%s1105_s0 + $0xac] ss:$8 sps:$4 sm:$0xff]   ;;  %v777_v33 = vld [vmem:[%s1105_s0 + $0xa8] ss:$8 sps:$4 sm:$0xff]   ;;  %v782_v35 = vld [vmem:[%s1105_s0 + $0xbc] ss:$8 sps:$4 sm:$0xff]  }
   0xb   :  { %154 = vmatprep.subr.bf16.mxu0 %v796_v0  ;;  %271 = vmatprep.subr.bf16.mxu1 %v796_v0  ;;  %v784_v36 = vld [vmem:[%s1105_s0 + $0x80] ss:$8 sps:$4 sm:$0xff]   ;;  %v786_v38 = vld [vmem:[%s1105_s0 + $0x94] ss:$8 sps:$4 sm:$0xff]   ;;  %v790_v42 = vld [vmem:[%s1105_s0 + $0x90] ss:$8 sps:$4 sm:$0xff]  }
   0xc   :  { %v785_v37 = vld [vmem:[%s1105_s0 + $0xb8] ss:$8 sps:$4 sm:$0xff]   ;;  %v788_v39 = vld [vmem:[%s1105_s0 + $0xcc] ss:$8 sps:$4 sm:$0xff]   ;;  %v791_v43 = vld [vmem:[%s1105_s0 + $0xc8] ss:$8 sps:$4 sm:$0xff]  }
   0xd   :  { %v694_v40 = vld [vmem:[%s1105_s0 + $0xa0] sm:$0x11]  ;;  %v713_v41 = vld [vmem:[%s1105_s0 + $0xd8] sm:$0x11] }
   0xe   :  { %155 = vmatpush1.bf16.msra.mxu0 %v847_v4  ;;  %272 = vmatpush1.bf16.msra.mxu1 %v847_v4  ;;  %v702_v44 = vcombine.high %v694_v40, %v694_v40  ;;  %v721_v45 = vcombine.high %v713_v41, %v713_v41  ;;  %v701_v46 = vcombine.low %v694_v40, %v694_v40 }
   0xf   :  { %156 = vmatprep.subr.bf16.mxu0 %v796_v0  ;;  %273 = vmatprep.subr.bf16.mxu1 %v796_v0  ;;  %v720_v47 = vcombine.low %v713_v41, %v713_v41 }
  0x12   :  { %157 = vmatpush1.bf16.msra.mxu0 %v863_v7  ;;  %274 = vmatpush1.bf16.msra.mxu1 %v863_v7 }
  0x13   :  { %158 = vmatprep.subr.bf16.mxu0 %v796_v0  ;;  %275 = vmatprep.subr.bf16.mxu1 %v796_v0 }
  0x16   :  { %159 = vmatpush1.bf16.msra.mxu0 %v873_v8  ;;  %276 = vmatpush1.bf16.msra.mxu1 %v873_v8 }
  0x17   :  { %160 = vmatprep.subr.bf16.mxu0 %v796_v0  ;;  %277 = vmatprep.subr.bf16.mxu1 %v796_v0 }
  0x1a   :  { %161 = vmatpush1.bf16.msra.mxu0 %v882_v9  ;;  %278 = vmatpush1.bf16.msra.mxu1 %v882_v9 }
  0x1b   :  { %162 = vmatprep.subr.bf16.mxu0 %v796_v0  ;;  %279 = vmatprep.subr.bf16.mxu1 %v796_v0 }
  0x1e   :  { %163 = vmatpush1.bf16.msra.mxu0 %v891_v10  ;;  %280 = vmatpush1.bf16.msra.mxu1 %v891_v10 }
  0x1f   :  { %164 = vmatprep.subr.bf16.mxu0 %v796_v0  ;;  %281 = vmatprep.subr.bf16.mxu1 %v796_v0 }
  0x22   :  { %165 = vmatpush1.bf16.msra.mxu0 %v900_v11  ;;  %282 = vmatpush1.bf16.msra.mxu1 %v900_v11 }
  0x23   :  { %166 = vmatprep.subr.bf16.mxu0 %v796_v0  ;;  %283 = vmatprep.subr.bf16.mxu1 %v796_v0 }
  0x26   :  { %167 = vmatpush1.bf16.msra.mxu0 %v911_v13  ;;  %284 = vmatpush1.bf16.msra.mxu1 %v911_v13 }
  0x27   :  { %389 = vmatprep.subr.bf16.mxu0 %v796_v0  ;;  %513 = vmatprep.subr.bf16.mxu1 %v796_v0 }
  0x29   :  { %181 = vmatmul.mubr.bf16.vlgmr.msra.gmra.mrb[0].mxu0 %v752_v14  ;;  %298 = vmatmul.mubr.bf16.vlgmr.msra.gmra.mrb[0].mxu1 %v755_v15 }
  0x2a   :  { %390 = vmatpush1.bf16.msra.mxu0 %v822_v1  ;;  %514 = vmatpush1.bf16.msra.mxu1 %v822_v1 }
  0x2b   :  { %391 = vmatprep.subr.bf16.mxu0 %v796_v0  ;;  %515 = vmatprep.subr.bf16.mxu1 %v796_v0 }
  0x2c   :  { %666 = vmatprep.mubr.msk.bf16.mxu0 %vm131_vm0, %v758_v16  ;;  %685 = vmatprep.mubr.msk.bf16.mxu1 %vm131_vm0, %v761_v17 }
  0x2e   :  { %392 = vmatpush1.bf16.msra.mxu0 %v829_v2  ;;  %516 = vmatpush1.bf16.msra.mxu1 %v829_v2 }
  0x2f   :  { %393 = vmatprep.subr.bf16.mxu0 %v796_v0  ;;  %517 = vmatprep.subr.bf16.mxu1 %v796_v0 }
  0x31   :  { %189 = vmatmul.mubr.bf16.gmra.mrb[4].mxu0 %v760_v18  ;;  %306 = vmatmul.mubr.bf16.gmra.mrb[4].mxu1 %v763_v19 }
  0x32   :  { %394 = vmatpush1.bf16.msra.mxu0 %v838_v3  ;;  %518 = vmatpush1.bf16.msra.mxu1 %v838_v3 }
  0x33   :  { %395 = vmatprep.subr.bf16.mxu0 %v796_v0  ;;  %519 = vmatprep.subr.bf16.mxu1 %v796_v0 }
  0x34   :  { %667 = vmatprep.mubr.msk.bf16.mxu0 %vm131_vm0, %v764_v20  ;;  %686 = vmatprep.mubr.msk.bf16.mxu1 %vm131_vm0, %v767_v21 }
  0x36   :  { %396 = vmatpush1.bf16.msra.mxu0 %v847_v4  ;;  %520 = vmatpush1.bf16.msra.mxu1 %v847_v4 }
  0x37   :  { %397 = vmatprep.subr.bf16.mxu0 %v796_v0  ;;  %521 = vmatprep.subr.bf16.mxu1 %v796_v0 }
  0x39   :  { %197 = vmatmul.mubr.bf16.gmra.mrb[8].mxu0 %v766_v22  ;;  %314 = vmatmul.mubr.bf16.gmra.mrb[8].mxu1 %v769_v23 }
  0x3a   :  { %398 = vmatpush1.bf16.msra.mxu0 %v863_v7  ;;  %522 = vmatpush1.bf16.msra.mxu1 %v863_v7 }
  0x3b   :  { %399 = vmatprep.subr.bf16.mxu0 %v796_v0  ;;  %523 = vmatprep.subr.bf16.mxu1 %v796_v0 }
  0x3c   :  { %668 = vmatprep.mubr.msk.bf16.mxu0 %vm131_vm0, %v654_v26  ;;  %687 = vmatprep.mubr.msk.bf16.mxu1 %vm131_vm0, %v683_v27 }
  0x3e   :  { %400 = vmatpush1.bf16.msra.mxu0 %v873_v8  ;;  %524 = vmatpush1.bf16.msra.mxu1 %v873_v8 }
  0x3f   :  { %401 = vmatprep.subr.bf16.mxu0 %v796_v0  ;;  %525 = vmatprep.subr.bf16.mxu1 %v796_v0 }
  0x41   :  { %205 = vmatmul.mubr.bf16.gmra.mrb[12].mxu0 %v653_v28  ;;  %322 = vmatmul.mubr.bf16.gmra.mrb[12].mxu1 %v682_v29  ;;  %v1065_v28 = vld [vmem:[%s1106_s2] ss:$0 sm:$0xff] }
  0x42   :  { %402 = vmatpush1.bf16.msra.mxu0 %v882_v9  ;;  %526 = vmatpush1.bf16.msra.mxu1 %v882_v9 }
  0x43   :  { %403 = vmatprep.subr.bf16.mxu0 %v796_v0  ;;  %527 = vmatprep.subr.bf16.mxu1 %v796_v0 }
  0x44   :  { %703 = vmatprep.mubr.msk.bf16.mxu0 %vm131_vm0, %v776_v30  ;;  %722 = vmatprep.mubr.msk.bf16.mxu1 %vm131_vm0, %v779_v31 }
  0x46   :  { %404 = vmatpush1.bf16.msra.mxu0 %v891_v10  ;;  %528 = vmatpush1.bf16.msra.mxu1 %v891_v10 }
  0x47   :  { %405 = vmatprep.subr.bf16.mxu0 %v796_v0  ;;  %529 = vmatprep.subr.bf16.mxu1 %v796_v0 }
  0x4a   :  { %406 = vmatpush1.bf16.msra.mxu0 %v900_v11  ;;  %530 = vmatpush1.bf16.msra.mxu1 %v900_v11 }
  0x4b   :  { %407 = vmatprep.subr.bf16.mxu0 %v796_v0  ;;  %531 = vmatprep.subr.bf16.mxu1 %v796_v0 }
  0x4e   :  { %408 = vmatpush1.bf16.msra.mxu0 %v911_v13  ;;  %532 = vmatpush1.bf16.msra.mxu1 %v911_v13 }
  0x51   :  { %422 = vmatmul.mubr.bf16.vlgmr.msra.gmra.mrb[16].mxu0 %v774_v32  ;;  %546 = vmatmul.mubr.bf16.vlgmr.msra.gmra.mrb[16].mxu1 %v777_v33 }
  0x52   :  { %704 = vmatprep.mubr.msk.bf16.mxu0 %vm131_vm0, %v780_v34  ;;  %723 = vmatprep.mubr.msk.bf16.mxu1 %vm131_vm0, %v782_v35 }
  0x59   :  { %430 = vmatmul.mubr.bf16.gmra.mrb[20].mxu0 %v784_v36  ;;  %554 = vmatmul.mubr.bf16.gmra.mrb[20].mxu1 %v785_v37 }
  0x5a   :  { %705 = vmatprep.mubr.msk.bf16.mxu0 %vm131_vm0, %v786_v38  ;;  %724 = vmatprep.mubr.msk.bf16.mxu1 %vm131_vm0, %v788_v39 }
  0x61   :  { %438 = vmatmul.mubr.bf16.gmra.mrb[24].mxu0 %v790_v42  ;;  %562 = vmatmul.mubr.bf16.gmra.mrb[24].mxu1 %v791_v43 }
  0x62   :  { %706 = vmatprep.mubr.msk.bf16.mxu0 %vm131_vm0, %v702_v44  ;;  %725 = vmatprep.mubr.msk.bf16.mxu1 %vm131_vm0, %v721_v45 }
  0x69   :  { %446 = vmatmul.mubr.bf16.gmra.mrb[28].mxu0 %v701_v46  ;;  %570 = vmatmul.mubr.bf16.gmra.mrb[28].mxu1 %v720_v47 }
  0xfc   :  { %v182_v48 = vpop.f32.mrb[0].mxu0  ;;  %v299_v49 = vpop.f32.mrb[0].mxu1 }
  0xfd   :  { %v329_v50 = vmax.f32 %v182_v48, %v299_v49  ;;  %v184_v51 = vpop.f32.mrb[1].mxu0  ;;  %v301_v52 = vpop.f32.mrb[1].mxu1 }
  0xfe   :  { %v185_v53 = vpop.f32.mrb[2].mxu0  ;;  %v302_v54 = vpop.f32.mrb[2].mxu1 }
  0xff   :  { %v330_v55 = vmax.f32 %v185_v53, %v302_v54  ;;  %v187_v56 = vpop.f32.mrb[3].mxu0  ;;  %v304_v57 = vpop.f32.mrb[3].mxu1 }
 0x104   :  { %v190_v58 = vpop.f32.mrb[4].mxu0  ;;  %v307_v59 = vpop.f32.mrb[4].mxu1 }
 0x105   :  { %v192_v60 = vpop.f32.mrb[5].mxu0  ;;  %v331_v61 = vmax.f32 %v190_v58, %v307_v59  ;;  %v309_v62 = vpop.f32.mrb[5].mxu1 }
 0x106   :  { %v193_v63 = vpop.f32.mrb[6].mxu0  ;;  %v310_v0 = vpop.f32.mrb[6].mxu1 }
 0x107   :  { %v195_v1 = vpop.f32.mrb[7].mxu0  ;;  %v332_v2 = vmax.f32 %v193_v63, %v310_v0  ;;  %v312_v3 = vpop.f32.mrb[7].mxu1 }
 0x10c   :  { %v1047_v4 = vpop.f32.mrb[8].mxu0  ;;  %v315_v5 = vpop.f32.mrb[8].mxu1 }
 0x10d   :  { %v200_v6 = vpop.f32.mrb[9].mxu0  ;;  %v333_v7 = vmax.f32 %v1047_v4, %v315_v5  ;;  %v317_v8 = vpop.f32.mrb[9].mxu1 }
 0x10e   :  { %v1050_v9 = vpop.f32.mrb[10].mxu0  ;;  %v1052_v10 = vpop.f32.mrb[10].mxu1 }
 0x10f   :  { %v203_v11 = vpop.f32.mrb[11].mxu0  ;;  %v334_v12 = vmax.f32 %v1050_v9, %v1052_v10  ;;  %v320_v13 = vpop.f32.mrb[11].mxu1 }
 0x114   :  { %v1056_v14 = vpop.f32.mrb[12].mxu0  ;;  %v1058_v15 = vpop.f32.mrb[12].mxu1 }
 0x115   :  { %v208_v16 = vpop.f32.mrb[13].mxu0  ;;  %v335_v17 = vmax.f32 %v1056_v14, %v1058_v15  ;;  %v325_v18 = vpop.f32.mrb[13].mxu1 }
 0x116   :  { %v209_v19 = vpop.f32.mrb[14].mxu0  ;;  %v326_v20 = vpop.f32.mrb[14].mxu1 }
 0x117   :  { %v210_v21 = vpop.f32.mrb[15].mxu0  ;;  %v327_v22 = vpop.f32.mrb[15].mxu1 }
 0x124   :  { %v423_v23 = vpop.f32.mrb[16].mxu0  ;;  %v547_v24 = vpop.f32.mrb[16].mxu1 }
 0x125   :  { %v453_v25 = vmax.f32 %v329_v50, %v423_v23  ;;  %v425_v26 = vpop.f32.mrb[17].mxu0  ;;  %v549_v27 = vpop.f32.mrb[17].mxu1 }
 0x126   :  { %v426_v29 = vpop.f32.mrb[18].mxu0  ;;  %v550_v30 = vpop.f32.mrb[18].mxu1 }
 0x127   :  { %v577_v31 = vmax.f32 %v453_v25, %v547_v24  ;;  %v454_v32 = vmax.f32 %v330_v55, %v426_v29  ;;  %v428_v33 = vpop.f32.mrb[19].mxu0  ;;  %v552_v34 = vpop.f32.mrb[19].mxu1 }
 0x129   :  { %v591_v35 = vadd.f32 %v1065_v28, %v577_v31  ;;  %v578_v36 = vmax.f32 %v454_v32, %v550_v30 }
 0x12b   :  { %v598_v37 = vmax.f32 %v591_v35, 0.0  ;;  %v592_v38 = vadd.f32 %v1065_v28, %v578_v36 }
 0x12c   :  { %v431_v39 = vpop.f32.mrb[20].mxu0  ;;  %v555_v40 = vpop.f32.mrb[20].mxu1 }
 0x12d   :  { %v734_v41 = vpack.c.bf16 %v598_v37, %v598_v37  ;;  %v599_v42 = vmax.f32 %v592_v38, 0.0  ;;  %v455_v43 = vmax.f32 %v331_v61, %v431_v39  ;;  %v433_v44 = vpop.f32.mrb[21].mxu0  ;;  %v557_v45 = vpop.f32.mrb[21].mxu1 }
 0x12e   :  { %v434_v46 = vpop.f32.mrb[22].mxu0  ;;  %v558_v47 = vpop.f32.mrb[22].mxu1 }
 0x12f   :  { %635 = vst.msk [vmem:[%s1107_s3] sm:$0xf] %vm634_vm2, %v734_v41  ;;  %v735_v48 = vpack.c.bf16 %v599_v42, %v599_v42  ;;  %v579_v49 = vmax.f32 %v455_v43, %v555_v40  ;;  %v456_v50 = vmax.f32 %v332_v2, %v434_v46  ;;  %v436_v51 = vpop.f32.mrb[23].mxu0  ;;  %v560_v52 = vpop.f32.mrb[23].mxu1 }
 0x131   :  { %636 = vst.msk [vmem:[%s1107_s3 + $0x4] sm:$0xf] %vm634_vm2, %v735_v48  ;;  %v593_v53 = vadd.f32 %v1065_v28, %v579_v49  ;;  %v580_v54 = vmax.f32 %v456_v50, %v558_v47 }
 0x133   :  { %v600_v55 = vmax.f32 %v593_v53, 0.0  ;;  %v594_v56 = vadd.f32 %v1065_v28, %v580_v54 }
 0x134   :  { %v439_v57 = vpop.f32.mrb[24].mxu0  ;;  %v563_v58 = vpop.f32.mrb[24].mxu1 }
 0x135   :  { %v736_v59 = vpack.c.bf16 %v600_v55, %v600_v55  ;;  %v601_v60 = vmax.f32 %v594_v56, 0.0  ;;  %v457_v61 = vmax.f32 %v333_v7, %v439_v57  ;;  %v441_v62 = vpop.f32.mrb[25].mxu0  ;;  %v565_v63 = vpop.f32.mrb[25].mxu1 }
 0x136   :  { %v442_v0 = vpop.f32.mrb[26].mxu0  ;;  %v566_v1 = vpop.f32.mrb[26].mxu1 }
 0x137   :  { %637 = vst.msk [vmem:[%s1107_s3 + $0x8] sm:$0xf] %vm634_vm2, %v736_v59  ;;  %v737_v2 = vpack.c.bf16 %v601_v60, %v601_v60  ;;  %v581_v3 = vmax.f32 %v457_v61, %v563_v58  ;;  %v458_v4 = vmax.f32 %v334_v12, %v442_v0  ;;  %v444_v5 = vpop.f32.mrb[27].mxu0  ;;  %v568_v6 = vpop.f32.mrb[27].mxu1 }
 0x139   :  { %638 = vst.msk [vmem:[%s1107_s3 + $0xc] sm:$0xf] %vm634_vm2, %v737_v2  ;;  %v595_v7 = vadd.f32 %v1065_v28, %v581_v3  ;;  %v582_v8 = vmax.f32 %v458_v4, %v566_v1 }
 0x13b   :  { %v602_v9 = vmax.f32 %v595_v7, 0.0  ;;  %v596_v10 = vadd.f32 %v1065_v28, %v582_v8 }
 0x13c   :  { %v447_v11 = vpop.f32.mrb[28].mxu0  ;;  %v571_v13 = vpop.f32.mrb[28].mxu1 }
 0x13d   :  { %v738_v16 = vpack.c.bf16 %v602_v9, %v602_v9  ;;  %v603_v18 = vmax.f32 %v596_v10, 0.0  ;;  %v459_v12 = vmax.f32 %v335_v17, %v447_v11  ;;  %v449_v19 = vpop.f32.mrb[29].mxu0  ;;  %v573_v20 = vpop.f32.mrb[29].mxu1 }
 0x13e   :  { %v450_v21 = vpop.f32.mrb[30].mxu0  ;;  %v574_v22 = vpop.f32.mrb[30].mxu1 }
 0x13f   :  { %639 = vst.msk [vmem:[%s1107_s3 + $0x10] sm:$0xf] %vm634_vm2, %v738_v16  ;;  %v739_v23 = vpack.c.bf16 %v603_v18, %v603_v18  ;;  %v583_v24 = vmax.f32 %v459_v12, %v571_v13  ;;  %v451_v25 = vpop.f32.mrb[31].mxu0  ;;  %v575_v26 = vpop.f32.mrb[31].mxu1 }
 0x141   :  { %640 = vst.msk [vmem:[%s1107_s3 + $0x14] sm:$0xf] %vm634_vm2, %v739_v23  ;;  %v597_v14 = vadd.f32 %v1065_v28, %v583_v24 }
 0x143   :  { %v604_v15 = vmax.f32 %v597_v14, 0.0 }
 0x145   :  { %v740_v17 = vpack.c.bf16 %v604_v15, %v604_v15 }
 0x147   :  { %642 = vst.msk [vmem:[%s1107_s3 + $0x18] sm:$0x1] %vm641_vm3, %v740_v17 }

// kernel: net_forward.5
= control target key start
LH: loop header
LB: loop body
LE: loop exit
PB: predicated region body
PF: predicated region fallthrough
CT: control target
= control target key end

     0   :  { %v770_v1 = vmov 0   ;;  %v98_v20 = vlaneseq  ;;  %v771_v25 = vmov 1966171168   ;;  %vm264_vm0 = vcmask 130048   ;;  %s981_s0 = inlined_call_operand.vmem [shape: bf16[2,400], index: 0, kind: input, shape index: {}]   ;;  %s982_s1 = inlined_call_operand.vmem [shape: bf16[400,120], index: 1, kind: input, shape index: {}]   ;;  %s983_s2 = inlined_call_operand.vmem [shape: f32[1,120], index: 2, kind: input, shape index: {}]   ;;  %s984_s3 = inlined_call_operand.vmem [shape: bf16[120,84], index: 3, kind: input, shape index: {}]   ;;  %s985_s4 = inlined_call_operand.vmem [shape: f32[1,84], index: 4, kind: input, shape index: {}]   ;;  %s986_s5 = inlined_call_operand.vmem [shape: bf16[84,10], index: 5, kind: input, shape index: {}]   ;;  %s987_s6 = inlined_call_operand.vmem [shape: f32[1,10], index: 6, kind: input, shape index: {}]   ;;  %s988_s7 = inlined_call_operand.hbm [shape: f32[2,10], index: 7, kind: output, shape index: {}]  }
   0x1   :  { %v707_v0 = vld [vmem:[%s982_s1 + $0x40] sm:$0xff]   ;;  %308 = vmatprep.subr.bf16.mxu1 %v770_v1  ;;  %v710_v4 = vld [vmem:[%s982_s1 + $0x48] sm:$0xff]   ;;  %v713_v7 = vld [vmem:[%s982_s1 + $0x50] sm:$0xff]   ;;  %v96_v26 = vunpack.c.l.s4 %v771_v25  ;;  %v772_v38 = vmov 0.0  }
   0x2   :  { %v708_v2 = vld [vmem:[%s982_s1 + $0x80] sm:$0xff]   ;;  %628 = vmatprep.subr.bf16.mxu0 %v707_v0  ;;  %v711_v5 = vld [vmem:[%s982_s1 + $0x88] sm:$0xff]   ;;  %v714_v8 = vld [vmem:[%s982_s1 + $0x90] sm:$0xff]   ;;  %v99_v27 = vshrl.u32 %v98_v20, 7 }
   0x3   :  { %v709_v3 = vld [vmem:[%s982_s1] sm:$0xff]   ;;  %309 = vmatpush1.bf16.msra.mxu1 %v708_v2  ;;  %v712_v6 = vld [vmem:[%s982_s1 + $0x8] sm:$0xff]   ;;  %v715_v9 = vld [vmem:[%s982_s1 + $0x10] sm:$0xff]   ;;  %v97_v30 = vunpack.c.0.s8 %v96_v26 }
   0x4   :  { %629 = vmatpush3.bf16.msra.mxu0 %v709_v3  ;;  %310 = vmatprep.subr.bf16.mxu1 %v770_v1  ;;  %v716_v10 = vld [vmem:[%s982_s1 + $0x58] sm:$0xff]   ;;  %v719_v13 = vld [vmem:[%s982_s1 + $0x60] sm:$0xff]   ;;  %v722_v16 = vld [vmem:[%s982_s1 + $0x68] sm:$0xff]  }
   0x5   :  { %630 = vmatprep.subr.bf16.mxu0 %v710_v4  ;;  %v717_v11 = vld [vmem:[%s982_s1 + $0x98] sm:$0xff]   ;;  %v720_v14 = vld [vmem:[%s982_s1 + $0xa0] sm:$0xff]   ;;  %v723_v17 = vld [vmem:[%s982_s1 + $0xa8] sm:$0xff]   ;;  %v100_v32 = vsub.s32 %v97_v30, %v99_v27 }
   0x6   :  { %v718_v12 = vld [vmem:[%s982_s1 + $0x18] sm:$0xff]   ;;  %v721_v15 = vld [vmem:[%s982_s1 + $0x20] sm:$0xff]   ;;  %v724_v18 = vld [vmem:[%s982_s1 + $0x28] sm:$0xff]  }
   0x7   :  { %311 = vmatpush1.bf16.msra.mxu1 %v711_v5  ;;  %v725_v19 = vld [vmem:[%s982_s1 + $0x70] sm:$0xff]   ;;  %v583_v23 = vld.sshfl [vmem:[%s981_s0] sm:$0x33 pattern:$0x75316420]  ;;  %v728_v24 = vld [vmem:[%s982_s1 + $0x78] sm:$0xff]  }
   0x8   :  { %631 = vmatpush3.bf16.msra.mxu0 %v712_v6  ;;  %312 = vmatprep.subr.bf16.mxu1 %v770_v1  ;;  %v726_v21 = vld [vmem:[%s982_s1 + $0xb0] sm:$0xff]   ;;  %v729_v28 = vld [vmem:[%s982_s1 + $0xb8] sm:$0xff]   ;;  %v94_v29 = vcombine.high %v583_v23, %v583_v23  ;;  %v731_v33 = vld [vmem:[%s982_s1 + $0xc0] sm:$0xff]   ;;  %v101_v36 = vrot.slane %v583_v23, %v100_v32 }
   0x9   :  { %632 = vmatprep.subr.bf16.mxu0 %v713_v7  ;;  %v727_v22 = vld [vmem:[%s982_s1 + $0x30] sm:$0xff]   ;;  %v730_v31 = vld [vmem:[%s982_s1 + $0x38] sm:$0xff]   ;;  %v732_v34 = vld [vmem:[%s984_s3] sm:$0xff]  }
   0xa   :  { %v108_v35 = vrot.slane %v94_v29, %v100_v32  ;;  %v109_v39 = vcombine.high %v101_v36, %v101_v36  ;;  %v733_v40 = vld [vmem:[%s984_s3 + $0x8] sm:$0xff]  }
   0xb   :  { %313 = vmatpush1.bf16.msra.mxu1 %v714_v8 }
   0xc   :  { %633 = vmatpush3.bf16.msra.mxu0 %v715_v9  ;;  %314 = vmatprep.subr.bf16.mxu1 %v770_v1  ;;  %v110_v37 = vcombine.high %v108_v35, %v108_v35 }
   0xd   :  { %634 = vmatprep.subr.bf16.mxu0 %v716_v10  ;;  %300 = vmatprep.mubr.bf16.mxu0 %v108_v35 }
   0xe   :  { %609 = vmatprep.mubr.msk.bf16.mxu1 %vm264_vm0, %v110_v37 }
   0xf   :  { %315 = vmatpush1.bf16.msra.mxu1 %v717_v11 }
  0x10   :  { %635 = vmatpush3.bf16.msra.mxu0 %v718_v12  ;;  %316 = vmatprep.subr.bf16.mxu1 %v770_v1 }
  0x11   :  { %636 = vmatprep.subr.bf16.mxu0 %v719_v13 }
  0x13   :  { %317 = vmatpush1.bf16.msra.mxu1 %v720_v14 }
  0x14   :  { %637 = vmatpush3.bf16.msra.mxu0 %v721_v15  ;;  %318 = vmatprep.subr.bf16.mxu1 %v770_v1 }
  0x15   :  { %638 = vmatprep.subr.bf16.mxu0 %v722_v16 }
  0x17   :  { %319 = vmatpush1.bf16.msra.mxu1 %v723_v17 }
  0x18   :  { %639 = vmatpush3.bf16.msra.mxu0 %v724_v18  ;;  %320 = vmatprep.subr.bf16.mxu1 %v770_v1 }
  0x19   :  { %640 = vmatprep.subr.bf16.mxu0 %v725_v19 }
  0x1b   :  { %321 = vmatpush1.bf16.msra.mxu1 %v726_v21 }
  0x1c   :  { %641 = vmatpush3.bf16.msra.mxu0 %v727_v22  ;;  %322 = vmatprep.subr.bf16.mxu1 %v770_v1 }
  0x1d   :  { %642 = vmatprep.subr.bf16.mxu0 %v728_v24 }
  0x1f   :  { %323 = vmatpush1.bf16.msra.mxu1 %v729_v28 }
  0x20   :  { %643 = vmatpush3.bf16.msra.mxu0 %v730_v31  ;;  %324 = vmatprep.subr.bf16.mxu1 %v770_v1 }
  0x21   :  { %666 = vmatprep.subr.bf16.mxu0 %v772_v38 }
  0x23   :  { %301 = vmatmul.mubr.bf16.vlgmr.msra.gmra.mrb[0].mxu0 %v101_v36  ;;  %325 = vmatpush1.bf16.msra.mxu1 %v731_v33 }
  0x24   :  { %667 = vmatpush3.bf16.msra.mxu0 %v732_v34 }
  0x25   :  { %12 = vsyncpa [#allocation3], 0  ;;  %668 = vmatprep.subr.bf16.mxu0 %v772_v38  ;;  %686 = vmatprep.subr.bf16.mxu1 %v772_v38  ;;  %v734_v41 = vld [vmem:[%s984_s3 + $0x10] sm:$0xff]   ;;  %v735_v42 = vld [vmem:[%s984_s3 + $0x18] sm:$0xff]   ;;  %vm421_vm1 = vcmask 1043456   ;;  %vm773_vm2 = vmmov 0  }
  0x26   :  { %341 = vmatmul.mubr.bf16.vlgmr.msra.gmra.mrb[0].mxu1 %v109_v39  ;;  %v736_v43 = vld [vmem:[%s984_s3 + $0x20] sm:$0xff]   ;;  %v737_v44 = vld [vmem:[%s984_s3 + $0x28] sm:$0xff]   ;;  %v738_v45 = vld [vmem:[%s984_s3 + $0x30] sm:$0xff]   ;;  %682 = vmatprep.mubr.msk.bf16.mxu0 %vm773_vm2, %v772_v38  ;;  %vm417_vm3 = vcmask 982016   ;;  %vm522_vm4 = vcmask 1041408   ;;  %vm518_vm5 = vcmask 687104  }
  0x27   :  { %v739_v46 = vld [vmem:[%s984_s3 + $0x38] ss:$0 sps:$4 sm:$0xff]   ;;  %698 = vmatprep.mubr.msk.bf16.mxu1 %vm773_vm2, %v772_v38  ;;  %v740_v48 = vld [vmem:[%s986_s5] sm:$0xff]   ;;  %v741_v49 = vld [vmem:[%s986_s5 + $0x8] sm:$0xff]   ;;  %vm566_vm6 = vcmask 74752  }
  0x28   :  { %669 = vmatpush3.bf16.msra.mxu0 %v733_v40  ;;  %v423_v47 = vsel %vm421_vm1, %v739_v46, 0  ;;  %687 = vmatpush3.bf16.msra.mxu1 %v740_v48  ;;  %v742_v50 = vld [vmem:[%s986_s5 + $0x10] sm:$0xff]   ;;  %v743_v51 = vld [vmem:[%s986_s5 + $0x18] sm:$0xff]   ;;  %v582_v54 = vld [vmem:[%s983_s2] ss:$0 sm:$0xff] }
  0x29   :  { %670 = vmatprep.subr.bf16.mxu0 %v772_v38  ;;  %688 = vmatprep.subr.bf16.mxu1 %v772_v38  ;;  %v744_v2 = vld [vmem:[%s986_s5 + $0x20] sm:$0xff]   ;;  %v745_v3 = vld [vmem:[%s986_s5 + $0x28] ss:$0 sps:$4 sm:$0x33]   ;;  %s774_s5 = smov [#allocation2]  }
  0x2a   :  { %v524_v4 = vsel %vm522_vm4, %v745_v3, 0  ;;  %v610_v5 = vld [vmem:[%s985_s4] ss:$0 sm:$0xff]  ;;  %s574_s12 = sshll.u32 %s774_s5, 4  ;;  %s575_s12 = int_to_ptr.vmem [resolvable:$true] %s574_s12 }
  0x2b   :  { %v620_v13 = vld [vmem:[%s987_s6] ss:$0 sm:$0xff]  ;;  %s746_s4 = scalar_lea.vmem %s575_s12, 32  ;;  %p751_p1 = scmp.lt.s32.totalorder %s575_s12, %s575_s12 }
  0x2c   :  { %671 = vmatpush3.bf16.msra.mxu0 %v734_v41  ;;  %689 = vmatpush3.bf16.msra.mxu1 %v741_v49  ;;  %p747_p0 = scmp.ne.s32.totalorder %s575_s12, %s746_s4  ;;  %p752_p2 = scmp.lt.s32.totalorder %s746_s4, %s746_s4 }
  0x2d   :  { %672 = vmatprep.subr.bf16.mxu0 %v772_v38  ;;  %690 = vmatprep.subr.bf16.mxu1 %v772_v38 }
  0x2e   :  { %p753_p3 = por %p752_p2, %p751_p1 }
  0x30   :  { %673 = vmatpush3.bf16.msra.mxu0 %v735_v42  ;;  %691 = vmatpush3.bf16.msra.mxu1 %v742_v50  ;;  %p754_p4 = pnand %p753_p3, %p747_p0 }
  0x31   :  { %674 = vmatprep.subr.bf16.mxu0 %v772_v38  ;;  %692 = vmatprep.subr.bf16.mxu1 %v772_v38 }
  0x34   :  { %675 = vmatpush3.bf16.msra.mxu0 %v736_v43  ;;  %693 = vmatpush3.bf16.msra.mxu1 %v743_v51 }
  0x35   :  { %676 = vmatprep.subr.bf16.mxu0 %v772_v38  ;;  %694 = vmatprep.subr.bf16.mxu1 %v772_v38 }
  0x38   :  { %677 = vmatpush3.bf16.msra.mxu0 %v737_v44  ;;  %695 = vmatpush3.bf16.msra.mxu1 %v744_v2 }
  0x39   :  { %678 = vmatprep.subr.bf16.mxu0 %v772_v38  ;;  %696 = vmatprep.subr.bf16.mxu1 %v772_v38 }
  0x3c   :  { %679 = vmatpush3.bf16.msra.mxu0 %v738_v45  ;;  %697 = vmatpush3.bf16.msra.mxu1 %v524_v4 }
  0x3d   :  { %680 = vmatprep.subr.bf16.mxu0 %v772_v38 }
  0x40   :  { %681 = vmatpush3.bf16.msra.mxu0 %v423_v47 }
  0xf6   :  { %v644_v52 = vpop.f32.mrb[0].mxu0 }
  0xf7   :  { %v645_v53 = vpop.f32.mrb[1].mxu0 }
  0xf8   :  { %v646_v55 = vadd.f32 %v645_v53, %v644_v52  ;;  %v647_v56 = vpop.f32.mrb[2].mxu0 }
  0xf9   :  { %v648_v57 = vpop.f32.mrb[3].mxu0  ;;  %v342_v58 = vpop.f32.mrb[0].mxu1 }
  0xfa   :  { %v303_v59 = vadd.f32 %v646_v55, %v582_v54  ;;  %v344_v60 = vpop.f32.mrb[1].mxu1 }
  0xfb   :  { %v345_v61 = vpop.f32.mrb[2].mxu1 }
  0xfc   :  { %v343_v62 = vadd.f32 %v342_v58, %v303_v59  ;;  %v346_v63 = vpop.f32.mrb[3].mxu1 }
  0xfe   :  { %v348_v0 = vmax.f32 %v343_v62, 0.0 }
 0x100   :  { %v349_v1 = vpack.c.bf16 %v348_v0, %v348_v0 }
 0x102   :  { %683 = vmatmul.mubr.msk.bf16.vlgmr.msra.gmra.mrb[4].mxu0 %vm417_vm3, %v349_v1 }
 0x1d5   :  { %v459_v6 = vpop.f32.mrb[4].mxu0 }
 0x1d6   :  { %v460_v7 = vadd.f32 %v610_v5, %v459_v6  ;;  %v684_v8 = vpop.f32.mrb[5].mxu0 }
 0x1d7   :  { %v462_v9 = vpop.f32.mrb[6].mxu0 }
 0x1d8   :  { %v465_v10 = vmax.f32 %v460_v7, 0.0  ;;  %v685_v11 = vpop.f32.mrb[7].mxu0 }
 0x1da   :  { %v466_v12 = vpack.c.bf16 %v465_v10, %v465_v10 }
 0x1dc   :  { %699 = vmatmul.mubr.msk.bf16.vlgmr.msra.gmra.mrb[4].mxu1 %vm518_vm5, %v466_v12 }
 0x2af   :  { %v560_v14 = vpop.f32.mrb[4].mxu1 }
 0x2b0   :  { %v561_v15 = vadd.f32 %v620_v13, %v560_v14  ;;  %v700_v16 = vpop.f32.mrb[5].mxu1 }
 0x2b1   :  { %v563_v17 = vpop.f32.mrb[6].mxu1 }
 0x2b2   :  { %v701_v18 = vpop.f32.mrb[7].mxu1  ;;  %567 = vst.msk [vmem:[#allocation2] sm:$0x3] %vm566_vm6, %v561_v15 }
 0x2b3   :  { %757 = shalt.err (!%p754_p4)
}
 0x2b4   :  { %s758_s6 = scalar_lea.hbm %s988_s7, 32 }
 0x2b5   :  { %p759_p5 = scmp.ne.s32.totalorder %s988_s7, %s758_s6  ;;  %p762_p6 = scmp.lt.u32.totalorder %s758_s6, %s988_s7 }
 0x2b7   :  { %p764_p7 = pnand %p762_p6, %p759_p5 }
 0x2b9   :  { %767 = shalt.err (!%p764_p7)
}
 0x2ba   :  { %577 = dma.vmem_to_hbm [thread:$0]  %s575_s12, 32, %s988_s7, [#allocation3]  }
 0x2bb   :  { %768 = dma.done.wait [#allocation3], 32  }
 0x2bc   :  { %769 = vsyncadd [#allocation3], 4294967264 }
 0x2bd   :  { %581 = vsyncpa [#allocation3], 1 }

</bundles_post_ra>
